<compile_context>
chip_gen: v7x
topology: tpu7x:2x2x1
jax: 0.10.0
libtpu: 0.0.40
codegen_flags: <defaults>
</compile_context>

<pallas_src>
import functools

import jax
import jax.numpy as jnp
from jax import lax
from jax.experimental import pallas as pl
from jax.experimental.pallas import tpu as pltpu


def _num_parallel_cores():
    """2 for chips that expose two TensorCores per device (v7x/v4/v5p), else 1."""
    try:
        kind = jax.devices()[0].device_kind.lower()
    except Exception:
        return 1
    return 2 if any(tag in kind for tag in ("v7", "v4", "v5p")) else 1


def _dim_emb_kernel(x_ref, w_ref, p_ref, o_ref, patches_ref,
                    *, H, W, KH, KW, BB, eps, inv_n):
    # x_ref:       (BB, Cin, (H+2*ph)*W)  row-padded, spatially flattened input
    # w_ref:       (Cout, 1 + Cin*KH*KW)  [bias | conv weight re-ordered (kh,kw,cin)]
    # p_ref:       (Cout, 2)              [gamma | beta]
    # o_ref:       (BB, Cout, H*W)        output slab (NCHW, HW flattened -> lane dense)
    # patches_ref: (1 + Cin*KH*KW, BB*HW) VMEM scratch for the im2col patch matrix
    Cin = x_ref.shape[1]
    Cout = o_ref.shape[1]
    HW = H * W
    pw = (KW - 1) // 2
    f32 = jnp.float32

    # ---- in-kernel im2col into VMEM scratch --------------------------------
    # Row 0 = ones so the conv bias (column 0 of w_ref) folds into the GEMM.
    patches_ref[0:1, :] = jnp.ones((1, BB * HW), dtype=f32)

    # Column index (w) of every flattened output position; masks hoisted out of
    # all loops (no per-iteration broadcasts).
    wcol = lax.broadcasted_iota(jnp.int32, (Cin, HW), 1) % W
    masks = {}
    for dw in range(-pw, pw + 1):
        if dw != 0:
            masks[dw] = (wcol + dw >= 0) & (wcol + dw < W)

    for b in range(BB):
        x = x_ref[b].astype(f32)                       # (Cin, (H+2*ph)*W)
        for kh in range(KH):
            # rows (h + kh) of the row-padded input, flattened: (Cin, HW)
            base = x[:, kh * W: kh * W + HW]
            for kw in range(KW):
                dw = kw - pw
                if dw == 0:
                    piece = base
                else:
                    # static lane shift by dw; wrapped / out-of-row lanes are the
                    # implicit zero 'same' padding along W -> mask them to 0.
                    shifted = jnp.concatenate([base[:, dw:], base[:, :dw]], axis=1)
                    piece = jnp.where(masks[dw], shifted, 0.0)
                r0 = 1 + (kh * KW + kw) * Cin
                patches_ref[r0:r0 + Cin, b * HW:(b + 1) * HW] = piece

    # ---- one MXU contraction for the whole batch-block (bias folded in) ----
    acc = jnp.dot(w_ref[...], patches_ref[...],
                  preferred_element_type=jnp.float32)   # (Cout, BB*HW), f32

    gamma = p_ref[:, 0:1]                               # (Cout, 1)
    beta = p_ref[:, 1:2]                                # (Cout, 1)

    # ---- fused GroupNorm(num_groups=1) per sample ---------------------------
    for b in range(BB):
        a = acc[:, b * HW:(b + 1) * HW]                 # (Cout, HW), lane-aligned
        stacked = jnp.concatenate([a, a * a], axis=0)   # share the lane-reduce pass
        red = jnp.sum(stacked, axis=-1, keepdims=True)  # (2*Cout, 1)
        s = jnp.sum(red[:Cout])
        ss = jnp.sum(red[Cout:])
        mean = s * inv_n
        var = ss * inv_n - mean * mean                  # one-pass var (f32)
        inv = lax.rsqrt(var + eps)                      # EUP slot
        scale = gamma * inv                             # (Cout, 1)
        shift = beta - mean * scale                     # (Cout, 1)
        o_ref[b] = (a * scale + shift).astype(o_ref.dtype)


def dimension_embedding(x_nchw, conv_w_oihw, conv_b, gn_gamma, gn_beta, eps=1e-5):
    """Forward pass of DimensionEmbedding.

    x_nchw:      (B, 2*audio_channel, H, W)           float32
    conv_w_oihw: (emb_dim, 2*audio_channel, KH, KW)   (default 3x3, padding='same')
    conv_b, gn_gamma, gn_beta: (emb_dim,)
    Returns (B, emb_dim, H, W).
    """
    B, Cin, H, W = x_nchw.shape
    Cout, Cin_w, KH, KW = conv_w_oihw.shape
    assert Cin_w == Cin and KH % 2 == 1 and KW % 2 == 1, "only odd 'same' kernels"
    ph = KH // 2
    HW = H * W
    Kp1 = 1 + Cin * KH * KW
    Wflat = (H + 2 * ph) * W

    # Grid = number of TensorCores that can run in parallel; each step handles a
    # batch-block of BB samples as one batched GEMM (v5e/v6e collapse to 1 step,
    # v7x keeps 2 so both cores are busy).
    G = max(1, min(B, _num_parallel_cores()))
    BB = -(-B // G)                  # ceil(B / G) samples per grid step
    Bp = G * BB

    # Glue (tiny): pad rows only (kw taps are generated in-kernel), flatten spatial.
    x_padded = jnp.pad(x_nchw, ((0, Bp - B), (0, 0), (ph, ph), (0, 0)))
    x_flat = x_padded.reshape(Bp, Cin, Wflat)          # contiguous -> metadata-only

    # Weight re-ordered to the in-kernel patch-row order (kh, kw, cin), bias folded
    # in as the leading column (matches the ones row of the patch matrix).
    w_r = jnp.transpose(conv_w_oihw, (0, 2, 3, 1)).reshape(Cout, Cin * KH * KW)
    w2b = jnp.concatenate([conv_b[:, None], w_r], axis=1)          # (Cout, Kp1)

    params = jnp.stack([gn_gamma, gn_beta], axis=1)                # (Cout, 2)

    kernel = functools.partial(
        _dim_emb_kernel, H=H, W=W, KH=KH, KW=KW, BB=BB,
        eps=float(eps), inv_n=1.0 / float(Cout * HW))

    out = pl.pallas_call(
        kernel,
        out_shape=jax.ShapeDtypeStruct((Bp, Cout, HW), x_nchw.dtype),
        grid_spec=pltpu.PrefetchScalarGridSpec(
            num_scalar_prefetch=0,
            grid=(G,),
            in_specs=[
                pl.BlockSpec((BB, Cin, Wflat), lambda g: (g, 0, 0)),
                pl.BlockSpec((Cout, Kp1), lambda g: (0, 0)),
                pl.BlockSpec((Cout, 2), lambda g: (0, 0)),
            ],
            out_specs=pl.BlockSpec((BB, Cout, HW), lambda g: (g, 0, 0)),
            scratch_shapes=[pltpu.VMEM((Kp1, BB * HW), jnp.float32)],
        ),
        compiler_params=pltpu.CompilerParams(
            dimension_semantics=("parallel",)),
    )(x_flat, w2b, params)

    # (Bp, Cout, H*W) -> (B, Cout, H, W): slice off batch padding, contiguous split.
    return out[:B].reshape(B, Cout, H, W)


def _reference(x_nchw, conv_w_oihw, conv_b, gn_gamma, gn_beta, eps=1e-5):
    """Pure-JAX reference (Conv2d 'same' + GroupNorm(1, C))."""
    y = lax.conv_general_dilated(
        x_nchw, conv_w_oihw, window_strides=(1, 1), padding="SAME",
        dimension_numbers=("NCHW", "OIHW", "NCHW"))
    y = y + conv_b[None, :, None, None]
    B = y.shape[0]
    yf = y.reshape(B, -1)
    mean = jnp.mean(yf, axis=1, keepdims=True)
    var = jnp.mean((yf - mean) ** 2, axis=1, keepdims=True)
    yn = ((yf - mean) / jnp.sqrt(var + eps)).reshape(y.shape)
    return yn * gn_gamma[None, :, None, None] + gn_beta[None, :, None, None]


if __name__ == "__main__":
    # Module defaults: audio_channel=1 -> Cin=2, emb_dim=48, kernel=(3,3), padding='same'
    B, Cin, H, W = 2, 2, 16, 16
    Cout = 48
    eps = 1e-5

    key = jax.random.PRNGKey(0)
    k_x, k_w, k_b, k_g, k_beta = jax.random.split(key, 5)

    x = jax.random.normal(k_x, (B, Cin, H, W), dtype=jnp.float32)
    conv_w = 0.1 * jax.random.normal(k_w, (Cout, Cin, 3, 3), dtype=jnp.float32)
    conv_b = 0.1 * jax.random.normal(k_b, (Cout,), dtype=jnp.float32)
    gn_gamma = 1.0 + 0.1 * jax.random.normal(k_g, (Cout,), dtype=jnp.float32)
    gn_beta = 0.1 * jax.random.normal(k_beta, (Cout,), dtype=jnp.float32)

    out = dimension_embedding(x, conv_w, conv_b, gn_gamma, gn_beta, eps)
    out = jax.block_until_ready(out)

    ref = _reference(x, conv_w, conv_b, gn_gamma, gn_beta, eps)
    assert out.shape == (B, Cout, H, W), out.shape
    assert jnp.allclose(out, ref, atol=1e-4, rtol=1e-4), float(
        jnp.max(jnp.abs(out - ref)))

    print("KERNEL_OK")
</pallas_src>

<mosaic_0001>
module attributes {stable_mosaic.version = 11 : i64} {
  func.func @_dim_emb_kernel(%arg0: i32, %arg1: memref<2x2x288xf32, #tpu.memory_space<vmem>>, %arg2: memref<48x19xf32, #tpu.memory_space<vmem>>, %arg3: memref<48x2xf32, #tpu.memory_space<vmem>>, %arg4: memref<2x48x256xf32, #tpu.memory_space<vmem>>, %arg5: memref<19x512xf32, #tpu.memory_space<vmem>>) attributes {dimension_semantics = [#tpu.dimension_semantics<parallel>], iteration_bounds = array<i64: 1>, scalar_prefetch = 0 : i64, scratch_operands = 1 : i64, tpu.core_type = #tpu.core_type<tc>, window_params = [{transform_indices = @transform_0, window_bounds = array<i64: 2, 2, 288>}, {pipeline_mode = #tpu.pipeline_mode<synchronous>, transform_indices = @transform_1, window_bounds = array<i64: 48, 19>}, {pipeline_mode = #tpu.pipeline_mode<synchronous>, transform_indices = @transform_2, window_bounds = array<i64: 48, 2>}, {transform_indices = @transform_3, window_bounds = array<i64: 2, 48, 256>}]} {
    %cst = arith.constant 1.000000e+00 : f32
    %0 = vector.broadcast %cst : f32 to vector<1x512xf32>
    %c0 = arith.constant 0 : index
    %c0_0 = arith.constant 0 : index
    %1 = vector.load %arg5[%c0, %c0_0] : memref<19x512xf32, #tpu.memory_space<vmem>>, vector<1x512xf32>
    tpu.vector_store %arg5[%c0, %c0_0], %0 {strides = array<i32>} : memref<19x512xf32, #tpu.memory_space<vmem>>, vector<1x512xf32>,
    %2 = tpu.iota {dimensions = array<i32: 1>} : vector<2x256xi32>
    %c16_i32 = arith.constant 16 : i32
    %c0_i32 = arith.constant 0 : i32
    %3 = arith.cmpi eq, %c16_i32, %c0_i32 : i32
    %c1_i32 = arith.constant 1 : i32
    %4 = arith.select %3, %c1_i32, %c16_i32 : i32
    %5 = vector.broadcast %4 : i32 to vector<2x256xi32>
    %6 = arith.remsi %2, %5 : vector<2x256xi32>
    %c0_i32_1 = arith.constant 0 : i32
    %7 = vector.broadcast %c0_i32_1 : i32 to vector<2x256xi32>
    %8 = arith.cmpi ne, %6, %7 : vector<2x256xi32>
    %c0_i32_2 = arith.constant 0 : i32
    %9 = vector.broadcast %c0_i32_2 : i32 to vector<2x256xi32>
    %10 = arith.cmpi slt, %6, %9 : vector<2x256xi32>
    %c0_i32_3 = arith.constant 0 : i32
    %11 = arith.cmpi slt, %4, %c0_i32_3 : i32
    %12 = vector.broadcast %11 : i1 to vector<2x256xi1>
    %13 = vector.broadcast %12 : vector<2x256xi1> to vector<2x256xi1>
    %14 = arith.xori %10, %13 : vector<2x256xi1>
    %15 = arith.andi %14, %8 : vector<2x256xi1>
    %16 = vector.broadcast %4 : i32 to vector<2x256xi32>
    %17 = arith.addi %6, %16 : vector<2x256xi32>
    %18 = arith.select %15, %17, %6 : vector<2x256xi1>, vector<2x256xi32>
    %c-1_i32 = arith.constant -1 : i32
    %19 = vector.broadcast %c-1_i32 : i32 to vector<2x256xi32>
    %20 = arith.addi %18, %19 : vector<2x256xi32>
    %c0_i32_4 = arith.constant 0 : i32
    %21 = vector.broadcast %c0_i32_4 : i32 to vector<2x256xi32>
    %22 = arith.cmpi sge, %20, %21 : vector<2x256xi32>
    %c-1_i32_5 = arith.constant -1 : i32
    %23 = vector.broadcast %c-1_i32_5 : i32 to vector<2x256xi32>
    %24 = arith.addi %18, %23 : vector<2x256xi32>
    %c16_i32_6 = arith.constant 16 : i32
    %25 = vector.broadcast %c16_i32_6 : i32 to vector<2x256xi32>
    %26 = arith.cmpi slt, %24, %25 : vector<2x256xi32>
    %27 = arith.andi %22, %26 : vector<2x256xi1>
    %c1_i32_7 = arith.constant 1 : i32
    %28 = vector.broadcast %c1_i32_7 : i32 to vector<2x256xi32>
    %29 = arith.addi %18, %28 : vector<2x256xi32>
    %c0_i32_8 = arith.constant 0 : i32
    %30 = vector.broadcast %c0_i32_8 : i32 to vector<2x256xi32>
    %31 = arith.cmpi sge, %29, %30 : vector<2x256xi32>
    %c1_i32_9 = arith.constant 1 : i32
    %32 = vector.broadcast %c1_i32_9 : i32 to vector<2x256xi32>
    %33 = arith.addi %18, %32 : vector<2x256xi32>
    %c16_i32_10 = arith.constant 16 : i32
    %34 = vector.broadcast %c16_i32_10 : i32 to vector<2x256xi32>
    %35 = arith.cmpi slt, %33, %34 : vector<2x256xi32>
    %36 = arith.andi %31, %35 : vector<2x256xi1>
    %c0_11 = arith.constant 0 : index
    %c0_12 = arith.constant 0 : index
    %c0_13 = arith.constant 0 : index
    %37 = vector.load %arg1[%c0_11, %c0_12, %c0_13] : memref<2x2x288xf32, #tpu.memory_space<vmem>>, vector<1x2x288xf32>
    %38 = vector.shape_cast %37 : vector<1x2x288xf32> to vector<2x288xf32>
    %39 = vector.extract_strided_slice %38 {offsets = [0, 0], sizes = [2, 256], strides = [1, 1]} : vector<2x288xf32> to vector<2x256xf32>
    %40 = vector.extract_strided_slice %39 {offsets = [0, 255], sizes = [2, 1], strides = [1, 1]} : vector<2x256xf32> to vector<2x1xf32>
    %41 = vector.extract_strided_slice %39 {offsets = [0, 0], sizes = [2, 255], strides = [1, 1]} : vector<2x256xf32> to vector<2x255xf32>
    %42 = tpu.concatenate %40, %41 in 1 : vector<2x1xf32>, vector<2x255xf32> -> vector<2x256xf32>
    %cst_14 = arith.constant 0.000000e+00 : f32
    %43 = vector.broadcast %cst_14 : f32 to vector<2x256xf32>
    %44 = arith.select %27, %42, %43 : vector<2x256xi1>, vector<2x256xf32>
    %c1 = arith.constant 1 : index
    %c0_15 = arith.constant 0 : index
    %45 = vector.load %arg5[%c1, %c0_15] : memref<19x512xf32, #tpu.memory_space<vmem>>, vector<2x256xf32>
    tpu.vector_store %arg5[%c1, %c0_15], %44 {strides = array<i32>} : memref<19x512xf32, #tpu.memory_space<vmem>>, vector<2x256xf32>,
    %c3 = arith.constant 3 : index
    %c0_16 = arith.constant 0 : index
    %46 = vector.load %arg5[%c3, %c0_16] : memref<19x512xf32, #tpu.memory_space<vmem>>, vector<2x256xf32>
    tpu.vector_store %arg5[%c3, %c0_16], %39 {strides = array<i32>} : memref<19x512xf32, #tpu.memory_space<vmem>>, vector<2x256xf32>,
    %47 = vector.extract_strided_slice %39 {offsets = [0, 1], sizes = [2, 255], strides = [1, 1]} : vector<2x256xf32> to vector<2x255xf32>
    %48 = vector.extract_strided_slice %39 {offsets = [0, 0], sizes = [2, 1], strides = [1, 1]} : vector<2x256xf32> to vector<2x1xf32>
    %49 = tpu.concatenate %47, %48 in 1 : vector<2x255xf32>, vector<2x1xf32> -> vector<2x256xf32>
    %cst_17 = arith.constant 0.000000e+00 : f32
    %50 = vector.broadcast %cst_17 : f32 to vector<2x256xf32>
    %51 = arith.select %36, %49, %50 : vector<2x256xi1>, vector<2x256xf32>
    %c5 = arith.constant 5 : index
    %c0_18 = arith.constant 0 : index
    %52 = vector.load %arg5[%c5, %c0_18] : memref<19x512xf32, #tpu.memory_space<vmem>>, vector<2x256xf32>
    tpu.vector_store %arg5[%c5, %c0_18], %51 {strides = array<i32>} : memref<19x512xf32, #tpu.memory_space<vmem>>, vector<2x256xf32>,
    %53 = vector.extract_strided_slice %38 {offsets = [0, 16], sizes = [2, 256], strides = [1, 1]} : vector<2x288xf32> to vector<2x256xf32>
    %54 = vector.extract_strided_slice %53 {offsets = [0, 255], sizes = [2, 1], strides = [1, 1]} : vector<2x256xf32> to vector<2x1xf32>
    %55 = vector.extract_strided_slice %53 {offsets = [0, 0], sizes = [2, 255], strides = [1, 1]} : vector<2x256xf32> to vector<2x255xf32>
    %56 = tpu.concatenate %54, %55 in 1 : vector<2x1xf32>, vector<2x255xf32> -> vector<2x256xf32>
    %cst_19 = arith.constant 0.000000e+00 : f32
    %57 = vector.broadcast %cst_19 : f32 to vector<2x256xf32>
    %58 = arith.select %27, %56, %57 : vector<2x256xi1>, vector<2x256xf32>
    %c7 = arith.constant 7 : index
    %c0_20 = arith.constant 0 : index
    %59 = vector.load %arg5[%c7, %c0_20] : memref<19x512xf32, #tpu.memory_space<vmem>>, vector<2x256xf32>
    tpu.vector_store %arg5[%c7, %c0_20], %58 {strides = array<i32>} : memref<19x512xf32, #tpu.memory_space<vmem>>, vector<2x256xf32>,
    %c9 = arith.constant 9 : index
    %c0_21 = arith.constant 0 : index
    %60 = vector.load %arg5[%c9, %c0_21] : memref<19x512xf32, #tpu.memory_space<vmem>>, vector<2x256xf32>
    tpu.vector_store %arg5[%c9, %c0_21], %53 {strides = array<i32>} : memref<19x512xf32, #tpu.memory_space<vmem>>, vector<2x256xf32>,
    %61 = vector.extract_strided_slice %53 {offsets = [0, 1], sizes = [2, 255], strides = [1, 1]} : vector<2x256xf32> to vector<2x255xf32>
    %62 = vector.extract_strided_slice %53 {offsets = [0, 0], sizes = [2, 1], strides = [1, 1]} : vector<2x256xf32> to vector<2x1xf32>
    %63 = tpu.concatenate %61, %62 in 1 : vector<2x255xf32>, vector<2x1xf32> -> vector<2x256xf32>
    %cst_22 = arith.constant 0.000000e+00 : f32
    %64 = vector.broadcast %cst_22 : f32 to vector<2x256xf32>
    %65 = arith.select %36, %63, %64 : vector<2x256xi1>, vector<2x256xf32>
    %c11 = arith.constant 11 : index
    %c0_23 = arith.constant 0 : index
    %66 = vector.load %arg5[%c11, %c0_23] : memref<19x512xf32, #tpu.memory_space<vmem>>, vector<2x256xf32>
    tpu.vector_store %arg5[%c11, %c0_23], %65 {strides = array<i32>} : memref<19x512xf32, #tpu.memory_space<vmem>>, vector<2x256xf32>,
    %67 = vector.extract_strided_slice %38 {offsets = [0, 32], sizes = [2, 256], strides = [1, 1]} : vector<2x288xf32> to vector<2x256xf32>
    %68 = vector.extract_strided_slice %67 {offsets = [0, 255], sizes = [2, 1], strides = [1, 1]} : vector<2x256xf32> to vector<2x1xf32>
    %69 = vector.extract_strided_slice %67 {offsets = [0, 0], sizes = [2, 255], strides = [1, 1]} : vector<2x256xf32> to vector<2x255xf32>
    %70 = tpu.concatenate %68, %69 in 1 : vector<2x1xf32>, vector<2x255xf32> -> vector<2x256xf32>
    %cst_24 = arith.constant 0.000000e+00 : f32
    %71 = vector.broadcast %cst_24 : f32 to vector<2x256xf32>
    %72 = arith.select %27, %70, %71 : vector<2x256xi1>, vector<2x256xf32>
    %c13 = arith.constant 13 : index
    %c0_25 = arith.constant 0 : index
    %73 = vector.load %arg5[%c13, %c0_25] : memref<19x512xf32, #tpu.memory_space<vmem>>, vector<2x256xf32>
    tpu.vector_store %arg5[%c13, %c0_25], %72 {strides = array<i32>} : memref<19x512xf32, #tpu.memory_space<vmem>>, vector<2x256xf32>,
    %c15 = arith.constant 15 : index
    %c0_26 = arith.constant 0 : index
    %74 = vector.load %arg5[%c15, %c0_26] : memref<19x512xf32, #tpu.memory_space<vmem>>, vector<2x256xf32>
    tpu.vector_store %arg5[%c15, %c0_26], %67 {strides = array<i32>} : memref<19x512xf32, #tpu.memory_space<vmem>>, vector<2x256xf32>,
    %75 = vector.extract_strided_slice %67 {offsets = [0, 1], sizes = [2, 255], strides = [1, 1]} : vector<2x256xf32> to vector<2x255xf32>
    %76 = vector.extract_strided_slice %67 {offsets = [0, 0], sizes = [2, 1], strides = [1, 1]} : vector<2x256xf32> to vector<2x1xf32>
    %77 = tpu.concatenate %75, %76 in 1 : vector<2x255xf32>, vector<2x1xf32> -> vector<2x256xf32>
    %cst_27 = arith.constant 0.000000e+00 : f32
    %78 = vector.broadcast %cst_27 : f32 to vector<2x256xf32>
    %79 = arith.select %36, %77, %78 : vector<2x256xi1>, vector<2x256xf32>
    %c17 = arith.constant 17 : index
    %c0_28 = arith.constant 0 : index
    %80 = vector.load %arg5[%c17, %c0_28] : memref<19x512xf32, #tpu.memory_space<vmem>>, vector<2x256xf32>
    tpu.vector_store %arg5[%c17, %c0_28], %79 {strides = array<i32>} : memref<19x512xf32, #tpu.memory_space<vmem>>, vector<2x256xf32>,
    %c1_29 = arith.constant 1 : index
    %c0_30 = arith.constant 0 : index
    %c0_31 = arith.constant 0 : index
    %81 = vector.load %arg1[%c1_29, %c0_30, %c0_31] : memref<2x2x288xf32, #tpu.memory_space<vmem>>, vector<1x2x288xf32>
    %82 = vector.shape_cast %81 : vector<1x2x288xf32> to vector<2x288xf32>
    %83 = vector.extract_strided_slice %82 {offsets = [0, 0], sizes = [2, 256], strides = [1, 1]} : vector<2x288xf32> to vector<2x256xf32>
    %84 = vector.extract_strided_slice %83 {offsets = [0, 255], sizes = [2, 1], strides = [1, 1]} : vector<2x256xf32> to vector<2x1xf32>
    %85 = vector.extract_strided_slice %83 {offsets = [0, 0], sizes = [2, 255], strides = [1, 1]} : vector<2x256xf32> to vector<2x255xf32>
    %86 = tpu.concatenate %84, %85 in 1 : vector<2x1xf32>, vector<2x255xf32> -> vector<2x256xf32>
    %cst_32 = arith.constant 0.000000e+00 : f32
    %87 = vector.broadcast %cst_32 : f32 to vector<2x256xf32>
    %88 = arith.select %27, %86, %87 : vector<2x256xi1>, vector<2x256xf32>
    %c1_33 = arith.constant 1 : index
    %c256 = arith.constant 256 : index
    %89 = vector.load %arg5[%c1_33, %c256] : memref<19x512xf32, #tpu.memory_space<vmem>>, vector<2x256xf32>
    tpu.vector_store %arg5[%c1_33, %c256], %88 {strides = array<i32>} : memref<19x512xf32, #tpu.memory_space<vmem>>, vector<2x256xf32>,
    %c3_34 = arith.constant 3 : index
    %c256_35 = arith.constant 256 : index
    %90 = vector.load %arg5[%c3_34, %c256_35] : memref<19x512xf32, #tpu.memory_space<vmem>>, vector<2x256xf32>
    tpu.vector_store %arg5[%c3_34, %c256_35], %83 {strides = array<i32>} : memref<19x512xf32, #tpu.memory_space<vmem>>, vector<2x256xf32>,
    %91 = vector.extract_strided_slice %83 {offsets = [0, 1], sizes = [2, 255], strides = [1, 1]} : vector<2x256xf32> to vector<2x255xf32>
    %92 = vector.extract_strided_slice %83 {offsets = [0, 0], sizes = [2, 1], strides = [1, 1]} : vector<2x256xf32> to vector<2x1xf32>
    %93 = tpu.concatenate %91, %92 in 1 : vector<2x255xf32>, vector<2x1xf32> -> vector<2x256xf32>
    %cst_36 = arith.constant 0.000000e+00 : f32
    %94 = vector.broadcast %cst_36 : f32 to vector<2x256xf32>
    %95 = arith.select %36, %93, %94 : vector<2x256xi1>, vector<2x256xf32>
    %c5_37 = arith.constant 5 : index
    %c256_38 = arith.constant 256 : index
    %96 = vector.load %arg5[%c5_37, %c256_38] : memref<19x512xf32, #tpu.memory_space<vmem>>, vector<2x256xf32>
    tpu.vector_store %arg5[%c5_37, %c256_38], %95 {strides = array<i32>} : memref<19x512xf32, #tpu.memory_space<vmem>>, vector<2x256xf32>,
    %97 = vector.extract_strided_slice %82 {offsets = [0, 16], sizes = [2, 256], strides = [1, 1]} : vector<2x288xf32> to vector<2x256xf32>
    %98 = vector.extract_strided_slice %97 {offsets = [0, 255], sizes = [2, 1], strides = [1, 1]} : vector<2x256xf32> to vector<2x1xf32>
    %99 = vector.extract_strided_slice %97 {offsets = [0, 0], sizes = [2, 255], strides = [1, 1]} : vector<2x256xf32> to vector<2x255xf32>
    %100 = tpu.concatenate %98, %99 in 1 : vector<2x1xf32>, vector<2x255xf32> -> vector<2x256xf32>
    %cst_39 = arith.constant 0.000000e+00 : f32
    %101 = vector.broadcast %cst_39 : f32 to vector<2x256xf32>
    %102 = arith.select %27, %100, %101 : vector<2x256xi1>, vector<2x256xf32>
    %c7_40 = arith.constant 7 : index
    %c256_41 = arith.constant 256 : index
    %103 = vector.load %arg5[%c7_40, %c256_41] : memref<19x512xf32, #tpu.memory_space<vmem>>, vector<2x256xf32>
    tpu.vector_store %arg5[%c7_40, %c256_41], %102 {strides = array<i32>} : memref<19x512xf32, #tpu.memory_space<vmem>>, vector<2x256xf32>,
    %c9_42 = arith.constant 9 : index
    %c256_43 = arith.constant 256 : index
    %104 = vector.load %arg5[%c9_42, %c256_43] : memref<19x512xf32, #tpu.memory_space<vmem>>, vector<2x256xf32>
    tpu.vector_store %arg5[%c9_42, %c256_43], %97 {strides = array<i32>} : memref<19x512xf32, #tpu.memory_space<vmem>>, vector<2x256xf32>,
    %105 = vector.extract_strided_slice %97 {offsets = [0, 1], sizes = [2, 255], strides = [1, 1]} : vector<2x256xf32> to vector<2x255xf32>
    %106 = vector.extract_strided_slice %97 {offsets = [0, 0], sizes = [2, 1], strides = [1, 1]} : vector<2x256xf32> to vector<2x1xf32>
    %107 = tpu.concatenate %105, %106 in 1 : vector<2x255xf32>, vector<2x1xf32> -> vector<2x256xf32>
    %cst_44 = arith.constant 0.000000e+00 : f32
    %108 = vector.broadcast %cst_44 : f32 to vector<2x256xf32>
    %109 = arith.select %36, %107, %108 : vector<2x256xi1>, vector<2x256xf32>
    %c11_45 = arith.constant 11 : index
    %c256_46 = arith.constant 256 : index
    %110 = vector.load %arg5[%c11_45, %c256_46] : memref<19x512xf32, #tpu.memory_space<vmem>>, vector<2x256xf32>
    tpu.vector_store %arg5[%c11_45, %c256_46], %109 {strides = array<i32>} : memref<19x512xf32, #tpu.memory_space<vmem>>, vector<2x256xf32>,
    %111 = vector.extract_strided_slice %82 {offsets = [0, 32], sizes = [2, 256], strides = [1, 1]} : vector<2x288xf32> to vector<2x256xf32>
    %112 = vector.extract_strided_slice %111 {offsets = [0, 255], sizes = [2, 1], strides = [1, 1]} : vector<2x256xf32> to vector<2x1xf32>
    %113 = vector.extract_strided_slice %111 {offsets = [0, 0], sizes = [2, 255], strides = [1, 1]} : vector<2x256xf32> to vector<2x255xf32>
    %114 = tpu.concatenate %112, %113 in 1 : vector<2x1xf32>, vector<2x255xf32> -> vector<2x256xf32>
    %cst_47 = arith.constant 0.000000e+00 : f32
    %115 = vector.broadcast %cst_47 : f32 to vector<2x256xf32>
    %116 = arith.select %27, %114, %115 : vector<2x256xi1>, vector<2x256xf32>
    %c13_48 = arith.constant 13 : index
    %c256_49 = arith.constant 256 : index
    %117 = vector.load %arg5[%c13_48, %c256_49] : memref<19x512xf32, #tpu.memory_space<vmem>>, vector<2x256xf32>
    tpu.vector_store %arg5[%c13_48, %c256_49], %116 {strides = array<i32>} : memref<19x512xf32, #tpu.memory_space<vmem>>, vector<2x256xf32>,
    %c15_50 = arith.constant 15 : index
    %c256_51 = arith.constant 256 : index
    %118 = vector.load %arg5[%c15_50, %c256_51] : memref<19x512xf32, #tpu.memory_space<vmem>>, vector<2x256xf32>
    tpu.vector_store %arg5[%c15_50, %c256_51], %111 {strides = array<i32>} : memref<19x512xf32, #tpu.memory_space<vmem>>, vector<2x256xf32>,
    %119 = vector.extract_strided_slice %111 {offsets = [0, 1], sizes = [2, 255], strides = [1, 1]} : vector<2x256xf32> to vector<2x255xf32>
    %120 = vector.extract_strided_slice %111 {offsets = [0, 0], sizes = [2, 1], strides = [1, 1]} : vector<2x256xf32> to vector<2x1xf32>
    %121 = tpu.concatenate %119, %120 in 1 : vector<2x255xf32>, vector<2x1xf32> -> vector<2x256xf32>
    %cst_52 = arith.constant 0.000000e+00 : f32
    %122 = vector.broadcast %cst_52 : f32 to vector<2x256xf32>
    %123 = arith.select %36, %121, %122 : vector<2x256xi1>, vector<2x256xf32>
    %c17_53 = arith.constant 17 : index
    %c256_54 = arith.constant 256 : index
    %124 = vector.load %arg5[%c17_53, %c256_54] : memref<19x512xf32, #tpu.memory_space<vmem>>, vector<2x256xf32>
    tpu.vector_store %arg5[%c17_53, %c256_54], %123 {strides = array<i32>} : memref<19x512xf32, #tpu.memory_space<vmem>>, vector<2x256xf32>,
    %c0_55 = arith.constant 0 : index
    %c0_56 = arith.constant 0 : index
    %125 = vector.load %arg2[%c0_55, %c0_56] : memref<48x19xf32, #tpu.memory_space<vmem>>, vector<48x19xf32>
    %c0_57 = arith.constant 0 : index
    %c0_58 = arith.constant 0 : index
    %126 = vector.load %arg5[%c0_57, %c0_58] : memref<19x512xf32, #tpu.memory_space<vmem>>, vector<19x512xf32>
    %cst_59 = arith.constant dense<0.000000e+00> : vector<48x512xf32>
    %127 = tpu.matmul %125, %126, %cst_59 {dimension_numbers = #tpu.dot_dimension_numbers<[1], [0], [0], [1], [0, 0, 1, 1], [], []>} : vector<48x19xf32>, vector<19x512xf32>, vector<48x512xf32> -> vector<48x512xf32>
    %c0_60 = arith.constant 0 : index
    %c0_61 = arith.constant 0 : index
    %128 = vector.load %arg3[%c0_60, %c0_61] : memref<48x2xf32, #tpu.memory_space<vmem>>, vector<48x1xf32>
    %c0_62 = arith.constant 0 : index
    %c1_63 = arith.constant 1 : index
    %129 = vector.load %arg3[%c0_62, %c1_63] : memref<48x2xf32, #tpu.memory_space<vmem>>, vector<48x1xf32>
    %130 = vector.extract_strided_slice %127 {offsets = [0, 0], sizes = [48, 256], strides = [1, 1]} : vector<48x512xf32> to vector<48x256xf32>
    %131 = arith.mulf %130, %130 : vector<48x256xf32>
    %132 = tpu.concatenate %130, %131 in 0 : vector<48x256xf32>, vector<48x256xf32> -> vector<96x256xf32>
    %cst_64 = arith.constant dense<0.000000e+00> : vector<96xf32>
    %133 = vector.multi_reduction <add>, %132, %cst_64 [1] : vector<96x256xf32> to vector<96xf32>
    %134 = vector.shape_cast %133 : vector<96xf32> to vector<96x1xf32>
    %135 = vector.extract_strided_slice %134 {offsets = [0, 0], sizes = [48, 1], strides = [1, 1]} : vector<96x1xf32> to vector<48x1xf32>
    %136 = vector.shape_cast %135 : vector<48x1xf32> to vector<1x48x1xf32>
    %cst_65 = arith.constant dense<0.000000e+00> : vector<1xf32>
    %137 = vector.multi_reduction <add>, %136, %cst_65 [1, 2] : vector<1x48x1xf32> to vector<1xf32>
    %138 = vector.shape_cast %137 : vector<1xf32> to vector<1x1x1xf32>
    %139 = vector.extract %138[0, 0, 0] : f32 from vector<1x1x1xf32>
    %140 = vector.extract_strided_slice %134 {offsets = [48, 0], sizes = [48, 1], strides = [1, 1]} : vector<96x1xf32> to vector<48x1xf32>
    %141 = vector.shape_cast %140 : vector<48x1xf32> to vector<1x48x1xf32>
    %cst_66 = arith.constant dense<0.000000e+00> : vector<1xf32>
    %142 = vector.multi_reduction <add>, %141, %cst_66 [1, 2] : vector<1x48x1xf32> to vector<1xf32>
    %143 = vector.shape_cast %142 : vector<1xf32> to vector<1x1x1xf32>
    %144 = vector.extract %143[0, 0, 0] : f32 from vector<1x1x1xf32>
    %cst_67 = arith.constant 8.13802107E-5 : f32
    %145 = arith.mulf %139, %cst_67 : f32
    %cst_68 = arith.constant 8.13802107E-5 : f32
    %146 = arith.mulf %144, %cst_68 : f32
    %147 = arith.mulf %145, %145 : f32
    %148 = arith.subf %146, %147 : f32
    %cst_69 = arith.constant 9.99999974E-6 : f32
    %149 = arith.addf %148, %cst_69 : f32
    %150 = math.rsqrt %149 : f32
    %151 = vector.broadcast %150 : f32 to vector<48x1xf32>
    %152 = arith.mulf %128, %151 : vector<48x1xf32>
    %153 = vector.broadcast %145 : f32 to vector<48x1xf32>
    %154 = arith.mulf %153, %152 : vector<48x1xf32>
    %155 = arith.subf %129, %154 : vector<48x1xf32>
    %156 = vector.broadcast %152 : vector<48x1xf32> to vector<48x256xf32>
    %157 = arith.mulf %130, %156 : vector<48x256xf32>
    %158 = vector.broadcast %155 : vector<48x1xf32> to vector<48x256xf32>
    %159 = arith.addf %157, %158 : vector<48x256xf32>
    %c0_70 = arith.constant 0 : index
    %c0_71 = arith.constant 0 : index
    %c0_72 = arith.constant 0 : index
    %160 = vector.load %arg4[%c0_70, %c0_71, %c0_72] : memref<2x48x256xf32, #tpu.memory_space<vmem>>, vector<1x48x256xf32>
    %161 = vector.shape_cast %160 : vector<1x48x256xf32> to vector<48x256xf32>
    %162 = vector.shape_cast %159 : vector<48x256xf32> to vector<1x48x256xf32>
    tpu.vector_store %arg4[%c0_70, %c0_71, %c0_72], %162 {strides = array<i32>} : memref<2x48x256xf32, #tpu.memory_space<vmem>>, vector<1x48x256xf32>,
    %163 = vector.extract_strided_slice %127 {offsets = [0, 256], sizes = [48, 256], strides = [1, 1]} : vector<48x512xf32> to vector<48x256xf32>
    %164 = arith.mulf %163, %163 : vector<48x256xf32>
    %165 = tpu.concatenate %163, %164 in 0 : vector<48x256xf32>, vector<48x256xf32> -> vector<96x256xf32>
    %cst_73 = arith.constant dense<0.000000e+00> : vector<96xf32>
    %166 = vector.multi_reduction <add>, %165, %cst_73 [1] : vector<96x256xf32> to vector<96xf32>
    %167 = vector.shape_cast %166 : vector<96xf32> to vector<96x1xf32>
    %168 = vector.extract_strided_slice %167 {offsets = [0, 0], sizes = [48, 1], strides = [1, 1]} : vector<96x1xf32> to vector<48x1xf32>
    %169 = vector.shape_cast %168 : vector<48x1xf32> to vector<1x48x1xf32>
    %cst_74 = arith.constant dense<0.000000e+00> : vector<1xf32>
    %170 = vector.multi_reduction <add>, %169, %cst_74 [1, 2] : vector<1x48x1xf32> to vector<1xf32>
    %171 = vector.shape_cast %170 : vector<1xf32> to vector<1x1x1xf32>
    %172 = vector.extract %171[0, 0, 0] : f32 from vector<1x1x1xf32>
    %173 = vector.extract_strided_slice %167 {offsets = [48, 0], sizes = [48, 1], strides = [1, 1]} : vector<96x1xf32> to vector<48x1xf32>
    %174 = vector.shape_cast %173 : vector<48x1xf32> to vector<1x48x1xf32>
    %cst_75 = arith.constant dense<0.000000e+00> : vector<1xf32>
    %175 = vector.multi_reduction <add>, %174, %cst_75 [1, 2] : vector<1x48x1xf32> to vector<1xf32>
    %176 = vector.shape_cast %175 : vector<1xf32> to vector<1x1x1xf32>
    %177 = vector.extract %176[0, 0, 0] : f32 from vector<1x1x1xf32>
    %cst_76 = arith.constant 8.13802107E-5 : f32
    %178 = arith.mulf %172, %cst_76 : f32
    %cst_77 = arith.constant 8.13802107E-5 : f32
    %179 = arith.mulf %177, %cst_77 : f32
    %180 = arith.mulf %178, %178 : f32
    %181 = arith.subf %179, %180 : f32
    %cst_78 = arith.constant 9.99999974E-6 : f32
    %182 = arith.addf %181, %cst_78 : f32
    %183 = math.rsqrt %182 : f32
    %184 = vector.broadcast %183 : f32 to vector<48x1xf32>
    %185 = arith.mulf %128, %184 : vector<48x1xf32>
    %186 = vector.broadcast %178 : f32 to vector<48x1xf32>
    %187 = arith.mulf %186, %185 : vector<48x1xf32>
    %188 = arith.subf %129, %187 : vector<48x1xf32>
    %189 = vector.broadcast %185 : vector<48x1xf32> to vector<48x256xf32>
    %190 = arith.mulf %163, %189 : vector<48x256xf32>
    %191 = vector.broadcast %188 : vector<48x1xf32> to vector<48x256xf32>
    %192 = arith.addf %190, %191 : vector<48x256xf32>
    %c1_79 = arith.constant 1 : index
    %c0_80 = arith.constant 0 : index
    %c0_81 = arith.constant 0 : index
    %193 = vector.load %arg4[%c1_79, %c0_80, %c0_81] : memref<2x48x256xf32, #tpu.memory_space<vmem>>, vector<1x48x256xf32>
    %194 = vector.shape_cast %193 : vector<1x48x256xf32> to vector<48x256xf32>
    %195 = vector.shape_cast %192 : vector<48x256xf32> to vector<1x48x256xf32>
    tpu.vector_store %arg4[%c1_79, %c0_80, %c0_81], %195 {strides = array<i32>} : memref<2x48x256xf32, #tpu.memory_space<vmem>>, vector<1x48x256xf32>,
    return
  }
  func.func @transform_0(%arg0: i32) -> (i32, i32, i32) {
    %c0_i32 = arith.constant 0 : i32
    %c0_i32_0 = arith.constant 0 : i32
    %c0_i32_1 = arith.constant 0 : i32
    return %arg0, %c0_i32, %c0_i32_0 : i32, i32, i32
  }
  func.func @transform_1(%arg0: i32) -> (i32, i32) {
    %c0_i32 = arith.constant 0 : i32
    %c0_i32_0 = arith.constant 0 : i32
    %c0_i32_1 = arith.constant 0 : i32
    return %c0_i32, %c0_i32_0 : i32, i32
  }
  func.func @transform_2(%arg0: i32) -> (i32, i32) {
    %c0_i32 = arith.constant 0 : i32
    %c0_i32_0 = arith.constant 0 : i32
    %c0_i32_1 = arith.constant 0 : i32
    return %c0_i32, %c0_i32_0 : i32, i32
  }
  func.func @transform_3(%arg0: i32) -> (i32, i32, i32) {
    %c0_i32 = arith.constant 0 : i32
    %c0_i32_0 = arith.constant 0 : i32
    %c0_i32_1 = arith.constant 0 : i32
    return %arg0, %c0_i32, %c0_i32_0 : i32, i32, i32
  }
}

</mosaic_0001>

<bundles_post_ra>
// kernel: tpu_custom_call.1
= control target key start
LH: loop header
LB: loop body
LE: loop exit
PB: predicated region body
PF: predicated region fallthrough
CT: control target
= control target key end

     0   :  { %v15_v0 = vlaneseq  ;;  %v1275_v2 = vmov 1983009808   ;;  %s1794_s0 = inlined_call_operand.vmem [shape: f32[2,2,288], index: 0, kind: input, shape index: {}]   ;;  %s1795_s1 = inlined_call_operand.vmem [shape: f32[48,19], index: 1, kind: input, shape index: {}]   ;;  %s1796_s2 = inlined_call_operand.vmem [shape: f32[48,2], index: 2, kind: input, shape index: {}]   ;;  %s1797_s3 = inlined_call_operand.hbm [shape: f32[2,48,256], index: 3, kind: output, shape index: {}]  }
   0x1   :  { %v64_v1 = vld [vmem:[%s1794_s0] sm:$0x3f]  ;;  %v67_v3 = vunpack.c.l.s4 %v1275_v2 }
   0x2   :  { %v70_v4 = vshrl.u32 %v15_v0, 7 }
   0x3   :  { %8 = vsyncpa [#allocation4], 0  ;;  %v68_v5 = vunpack.c.0.s8 %v67_v3  ;;  %v120_v6 = vcombine.high %v64_v1, %v64_v1  ;;  %s1276_s14 = smov 111   ;;  %s1277_s15 = smov 1   ;;  %vm17_vm0 = vcmp.lt.s32.totalorder %v15_v0, 512  ;;  %v1279_v13 = vmov 1.0  }
   0x4   :  { %s1278_s16 = smov 127   ;;  %19 = vst.msk [vmem:[#allocation2] ss:$8 sm:$0xf] %vm17_vm0, %v1279_v13  ;;  %s1280_s17 = smov 113   ;;  %v1285_v25 = vmov 0.0  }
   0x5   :  { %v71_v7 = vsub.s32 %v68_v5, %v70_v4  ;;  %s1281_s18 = smov 97   ;;  %s1282_s19 = smov 112   ;;  %v1188_v20 = vld [vmem:[%s1794_s0 + $0x6] sm:$0x3f]  ;;  %555 = vmatprep.mubr.f32.mxu0 %v1285_v25  ;;  %656 = vmatprep.mubr.f32.mxu1 %v1285_v25  ;;  %v22_v34 = vand.u32 127, %v15_v0  ;;  %vm79_vm1 = vcmask 7168  }
   0x6   :  { %s1283_s20 = smov 96   ;;  %s1284_s23 = smov 95   ;;  %v311_v22 = vcombine.high %v1188_v20, %v1188_v20  ;;  %vm104_vm4 = vcmask 1039360   ;;  %vm175_vm7 = vcmask 908288   ;;  %vm135_vm8 = vcmask 924672  }
   0x7   :  { %v127_v8 = vrot.slane %v120_v6, %v71_v7  ;;  %v72_v9 = vrot.slane %v64_v1, %v71_v7  ;;  %v265_v21 = vrot.slane %v1188_v20, %v71_v7  ;;  %v23_v35 = vadd.s32 128, %v22_v34 }
   0x8   :  { %v318_v24 = vrot.slane %v311_v22, %v71_v7  ;;  %v28_v36 = vand.u32 15, %v22_v34  ;;  %vm199_vm9 = vcmask 793600   ;;  %vm162_vm10 = vcmask 916480  }
   0x9   :  { %173 = vrot.lane.b32.xlu0 %v127_v8, %s1276_s14  ;;  %77 = vrot.lane.b32.xlu1 %v72_v9, %s1277_s15  ;;  %v73_v10 = vcombine.high %v72_v9, %v72_v9  ;;  %v94_v12 = vrot.slane %v72_v9, 5  ;;  %v155_v15 = vrot.slane %v127_v8, 7  ;;  %v217_v17 = vrot.slane %v127_v8, 1 }
   0xa   :  { %v153_v18 = vrot.slane %v72_v9, 7  ;;  %v215_v19 = vrot.slane %v72_v9, 1  ;;  %v266_v23 = vcombine.high %v265_v21, %v265_v21  ;;  %v286_v27 = vrot.slane %v265_v21, 5 }
   0xb   :  { %v95_v11 = vrot.slane %v73_v10, 5  ;;  %98 = vst [vmem:[#allocation2] sm:$0x18] %v94_v12  ;;  %v154_v14 = vrot.slane %v73_v10, 7  ;;  %v216_v16 = vrot.slane %v73_v10, 1  ;;  %v345_v29 = vrot.slane %v318_v24, 7 }
   0xc   :  { %v287_v26 = vrot.slane %v266_v23, 5  ;;  %290 = vst [vmem:[#allocation2 + $0x10] sm:$0x18] %v286_v27  ;;  %v344_v28 = vrot.slane %v266_v23, 7  ;;  %v403_v30 = vrot.slane %v266_v23, 1  ;;  %v404_v31 = vrot.slane %v318_v24, 1 }
   0xd   :  { %100 = vrot.lane.b32.xlu0 %v72_v9, %s1278_s16  ;;  %74 = vrot.lane.b32.xlu1 %v73_v10, %s1277_s15  ;;  %99 = vst [vmem:[#allocation2 + $0x8] sm:$0x18] %v95_v11  ;;  %v343_v32 = vrot.slane %v265_v21, 7  ;;  %v402_v33 = vrot.slane %v265_v21, 1  ;;  %v35_v37 = vand.u32 15, %v23_v35  ;;  %v1366_v38 = vadd.s32 4294967295, %v28_v36 }
   0xe   :  { %291 = vst [vmem:[#allocation2 + $0x18] sm:$0x18] %v287_v26  ;;  %v1372_v42 = vadd.s32 1, %v28_v36  ;;  %vm224_vm11 = vcmask 785408   ;;  %vm239_vm12 = vcmask 777216   ;;  %vm478_vm13 = vcmask 1042432  }
   0xf   :  { %v1368_v39 = vadd.s32 4294967295, %v35_v37  ;;  %vm50_vm2 = vcmp.ge.s32.totalorder %v1366_v38, 0  ;;  %v1374_v43 = vadd.s32 1, %v35_v37  ;;  %vm459_vm14 = vcmask 154624  }
  0x10   :  { %vm60_vm5 = vcmp.lt.s32.totalorder %v1372_v42, 16 }
  0x11   :  { %102 = vrot.lane.b32.xlu1 %v73_v10, %s1278_s16  ;;  %171 = vrot.lane.b32.xlu0 %v73_v10, %s1276_s14  ;;  %vm51_vm3 = vcmp.ge.s32.totalorder %v1368_v39, 0  ;;  %vm61_vm6 = vcmp.lt.s32.totalorder %v1374_v43, 16 }
  0x15   :  { %131 = vrot.lane.b32.xlu1 %v72_v9, %s1280_s17  ;;  %128 = vrot.lane.b32.xlu0 %v127_v8, %s1280_s17 }
  0x19   :  { %169 = vrot.lane.b32.xlu1 %v72_v9, %s1276_s14  ;;  %133 = vrot.lane.b32.xlu0 %v73_v10, %s1280_s17 }
  0x1d   :  { %195 = vrot.lane.b32.xlu1 %v72_v9, %s1281_s18  ;;  %192 = vrot.lane.b32.xlu0 %v127_v8, %s1281_s18 }
  0x21   :  { %197 = vrot.lane.b32.xlu0 %v73_v10, %s1281_s18  ;;  %158 = vrot.lane.b32.xlu1 %v154_v14, %s1282_s19 }
  0x25   :  { %160 = vrot.lane.b32.xlu0 %v155_v15, %s1282_s19  ;;  %220 = vrot.lane.b32.xlu1 %v216_v16, %s1283_s20 }
  0x29   :  { %222 = vrot.lane.b32.xlu0 %v217_v17, %s1283_s20  ;;  %156 = vrot.lane.b32.xlu1 %v153_v18, %s1282_s19 }
  0x2d   :  { %218 = vrot.lane.b32.xlu0 %v215_v19, %s1283_s20  ;;  %235 = vrot.lane.b32.xlu1 %v73_v10, %s1284_s23 }
  0x31   :  { %237 = vrot.lane.b32.xlu0 %v127_v8, %s1284_s23  ;;  %233 = vrot.lane.b32.xlu1 %v72_v9, %s1284_s23 }
  0x35   :  { %360 = vrot.lane.b32.xlu0 %v266_v23, %s1276_s14  ;;  %362 = vrot.lane.b32.xlu1 %v318_v24, %s1276_s14 }
  0x39   :  { %267 = vrot.lane.b32.xlu0 %v266_v23, %s1277_s15  ;;  %270 = vrot.lane.b32.xlu1 %v265_v21, %s1277_s15 }
  0x3d   :  { %292 = vrot.lane.b32.xlu0 %v265_v21, %s1278_s16  ;;  %294 = vrot.lane.b32.xlu1 %v266_v23, %s1278_s16 }
  0x41   :  { %319 = vrot.lane.b32.xlu0 %v318_v24, %s1280_s17  ;;  %322 = vrot.lane.b32.xlu1 %v265_v21, %s1280_s17 }
  0x45   :  { %324 = vrot.lane.b32.xlu0 %v266_v23, %s1280_s17  ;;  %358 = vrot.lane.b32.xlu1 %v265_v21, %s1276_s14 }
  0x49   :  { %380 = vrot.lane.b32.xlu0 %v318_v24, %s1281_s18  ;;  %383 = vrot.lane.b32.xlu1 %v265_v21, %s1281_s18 }
  0x4d   :  { %385 = vrot.lane.b32.xlu0 %v266_v23, %s1281_s18  ;;  %348 = vrot.lane.b32.xlu1 %v344_v28, %s1282_s19 }
  0x51   :  { %350 = vrot.lane.b32.xlu0 %v345_v29, %s1282_s19  ;;  %407 = vrot.lane.b32.xlu1 %v403_v30, %s1283_s20 }
  0x55   :  { %409 = vrot.lane.b32.xlu0 %v404_v31, %s1283_s20  ;;  %346 = vrot.lane.b32.xlu1 %v343_v32, %s1282_s19 }
  0x59   :  { %405 = vrot.lane.b32.xlu0 %v402_v33, %s1283_s20  ;;  %421 = vrot.lane.b32.xlu1 %v266_v23, %s1284_s23 }
  0x5d   :  { %423 = vrot.lane.b32.xlu0 %v318_v24, %s1284_s23  ;;  %419 = vrot.lane.b32.xlu1 %v265_v21, %s1284_s23 }
  0x7b   :  { %v174_v40 = vpop.permute.xlu0 %173  ;;  %v78_v41 = vpop.permute.xlu1 %77 }
  0x7f   :  { %v101_v44 = vpop.permute.xlu0 %100  ;;  %v75_v45 = vpop.permute.xlu1 %74 }
  0x80   :  { %v80_v46 = vsel %vm79_vm1, %v78_v41, %v75_v45  ;;  %v83_v47 = vsel %vm79_vm1, %v75_v45, %v78_v41 }
  0x81   :  { %v84_v48 = vsel %vm50_vm2, %v83_v47, 0.0  ;;  %v85_v49 = vsel %vm51_vm3, %v80_v46, 0.0 }
  0x82   :  { %v88_v50 = vrot.slane %v84_v48, 7  ;;  %v89_v51 = vrot.slane %v85_v49, 7 }
  0x83   :  { %v103_v52 = vpop.permute.xlu1 %102  ;;  %v172_v53 = vpop.permute.xlu0 %171 }
  0x84   :  { %92 = vst [vmem:[#allocation2] sm:$0x6] %v88_v50  ;;  %93 = vst [vmem:[#allocation2 + $0x8] sm:$0x6] %v89_v51  ;;  %v105_v54 = vsel %vm104_vm4, %v101_v44, %v103_v52  ;;  %v109_v55 = vsel %vm104_vm4, %v103_v52, %v101_v44  ;;  %v177_v62 = vsel %vm175_vm7, %v172_v53, %v174_v40 }
  0x85   :  { %v110_v56 = vsel %vm60_vm5, %v105_v54, 0.0  ;;  %v111_v57 = vsel %vm61_vm6, %v109_v55, 0.0 }
  0x86   :  { %v114_v58 = vrot.slane %v110_v56, 3  ;;  %v115_v59 = vrot.slane %v111_v57, 3 }
  0x87   :  { %v132_v60 = vpop.permute.xlu1 %131  ;;  %v129_v61 = vpop.permute.xlu0 %128 }
  0x88   :  { %118 = vst [vmem:[#allocation2] sm:$0x60] %v114_v58  ;;  %119 = vst [vmem:[#allocation2 + $0x8] sm:$0x60] %v115_v59 }
  0x8b   :  { %v170_v63 = vpop.permute.xlu1 %169  ;;  %v134_v0 = vpop.permute.xlu0 %133 }
  0x8c   :  { %v176_v1 = vsel %vm175_vm7, %v170_v63, %v172_v53  ;;  %v181_v2 = vsel %vm104_vm4, %v177_v62, %v170_v63  ;;  %v136_v3 = vsel %vm135_vm8, %v132_v60, %v134_v0  ;;  %v137_v4 = vsel %vm135_vm8, %v134_v0, %v129_v61 }
  0x8d   :  { %v182_v5 = vsel %vm60_vm5, %v176_v1, 0.0  ;;  %v183_v6 = vsel %vm61_vm6, %v181_v2, 0.0  ;;  %v140_v7 = vsel %vm79_vm1, %v129_v61, %v136_v3  ;;  %v142_v8 = vsel %vm51_vm3, %v137_v4, 0.0 }
  0x8e   :  { %v186_v9 = vrot.slane %v182_v5, 5  ;;  %v187_v10 = vrot.slane %v183_v6, 5  ;;  %v141_v11 = vsel %vm50_vm2, %v140_v7, 0.0  ;;  %v146_v12 = vrot.slane %v142_v8, 1  ;;  %v1433_v6 = vld [vmem:[%s1795_s1] sm:$0xff] }
  0x8f   :  { %v145_v13 = vrot.slane %v141_v11, 1  ;;  %v196_v14 = vpop.permute.xlu1 %195  ;;  %v193_v15 = vpop.permute.xlu0 %192 }
  0x90   :  { %190 = vst [vmem:[#allocation2 + $0x20] sm:$0x18] %v186_v9  ;;  %191 = vst [vmem:[#allocation2 + $0x28] sm:$0x18] %v187_v10 }
  0x91   :  { %150 = vst [vmem:[#allocation2 + $0x28] ss:$-28 sps:$4 sm:$0x81] %v146_v12   ;;  %149 = vst [vmem:[#allocation2 + $0x20] ss:$-28 sps:$4 sm:$0x81] %v145_v13  }
  0x93   :  { %v198_v16 = vpop.permute.xlu0 %197  ;;  %v159_v17 = vpop.permute.xlu1 %158 }
  0x94   :  { %v200_v18 = vsel %vm199_vm9, %v196_v14, %v198_v16  ;;  %v201_v19 = vsel %vm199_vm9, %v198_v16, %v193_v15  ;;  %v1447_v14 = vld [vmem:[%s1795_s1 + $0x8] sm:$0xff] }
  0x95   :  { %v204_v20 = vsel %vm79_vm1, %v193_v15, %v200_v18  ;;  %v206_v21 = vsel %vm51_vm3, %v201_v19, 0.0 }
  0x96   :  { %v205_v22 = vsel %vm50_vm2, %v204_v20, 0.0  ;;  %v210_v23 = vrot.slane %v206_v21, 3 }
  0x97   :  { %v209_v24 = vrot.slane %v205_v22, 3  ;;  %v161_v26 = vpop.permute.xlu0 %160  ;;  %v221_v27 = vpop.permute.xlu1 %220  ;;  %v1460_v22 = vld [vmem:[%s1795_s1 + $0x10] sm:$0xff] }
  0x98   :  { %214 = vst [vmem:[#allocation2 + $0x28] sm:$0x60] %v210_v23  ;;  %v164_v28 = vsel %vm162_vm10, %v159_v17, %v161_v26  ;;  %v448_v44 = vld [vmem:[#allocation2 + $0x8] sm:$0xff]  ;;  %v447_v54 = vld [vmem:[#allocation2] sm:$0xff] }
  0x99   :  { %213 = vst [vmem:[#allocation2 + $0x20] sm:$0x60] %v209_v24  ;;  %168 = vst [vmem:[#allocation2 + $0x28] sm:$0x6] %v164_v28 }
  0x9b   :  { %v223_v29 = vpop.permute.xlu0 %222  ;;  %v157_v30 = vpop.permute.xlu1 %156 }
  0x9c   :  { %v226_v31 = vsel %vm224_vm11, %v221_v27, %v223_v29  ;;  %v163_v32 = vsel %vm162_vm10, %v157_v30, %v159_v17 }
  0x9d   :  { %230 = vst [vmem:[#allocation2 + $0x48] ss:$-28 sps:$4 sm:$0x81] %v226_v31   ;;  %167 = vst [vmem:[#allocation2 + $0x20] sm:$0x6] %v163_v32 }
  0x9f   :  { %v219_v33 = vpop.permute.xlu0 %218  ;;  %v236_v34 = vpop.permute.xlu1 %235 }
  0xa0   :  { %v225_v35 = vsel %vm224_vm11, %v219_v33, %v221_v27 }
  0xa1   :  { %229 = vst [vmem:[#allocation2 + $0x40] ss:$-28 sps:$4 sm:$0x81] %v225_v35   ;;  %v1477_v35 = vld [vmem:[%s1795_s1 + $0x18] sm:$0xff] }
  0xa3   :  { %v238_v36 = vpop.permute.xlu0 %237  ;;  %v234_v37 = vpop.permute.xlu1 %233 }
  0xa4   :  { %v241_v40 = vsel %vm239_vm12, %v236_v34, %v238_v36  ;;  %v240_v41 = vsel %vm239_vm12, %v234_v37, %v236_v34  ;;  %v452_v45 = vld [vmem:[#allocation2 + $0x28] sm:$0xff] }
  0xa5   :  { %v245_v46 = vsel %vm104_vm4, %v241_v40, %v234_v37  ;;  %v246_v47 = vsel %vm60_vm5, %v240_v41, 0.0  ;;  %v1205_v48 = vpack.c.bf16 %v452_v45, %v448_v44  ;;  %v445_v44 = vld [vmem:[%s1795_s1 + $0x20] sm:$0xff] }
  0xa6   :  { %v247_v49 = vsel %vm61_vm6, %v245_v46, 0.0  ;;  %v250_v50 = vrot.slane %v246_v47, 7 }
  0xa7   :  { %v251_v51 = vrot.slane %v247_v49, 7  ;;  %v361_v52 = vpop.permute.xlu0 %360  ;;  %1206 = vmatprep.subr.bf16.mxu0 %v1205_v48  ;;  %v363_v53 = vpop.permute.xlu1 %362 }
  0xa8   :  { %254 = vst [vmem:[#allocation2 + $0x40] sm:$0x6] %v250_v50  ;;  %v451_v55 = vld [vmem:[#allocation2 + $0x20] sm:$0xff]  ;;  %v365_v15 = vsel %vm175_vm7, %v361_v52, %v363_v53  ;;  %v446_v53 = vld [vmem:[%s1795_s1 + $0x28] sm:$0xff] }
  0xa9   :  { %255 = vst [vmem:[#allocation2 + $0x48] sm:$0x6] %v251_v51  ;;  %v1207_v56 = vpack.c.bf16 %v451_v55, %v447_v54 }
  0xab   :  { %v268_v57 = vpop.permute.xlu0 %267  ;;  %1208 = vmatpush1.bf16.msra.mxu0 %v1207_v56  ;;  %v271_v58 = vpop.permute.xlu1 %270 }
  0xac   :  { %v272_v59 = vsel %vm79_vm1, %v271_v58, %v268_v57  ;;  %v275_v60 = vsel %vm79_vm1, %v268_v57, %v271_v58 }
  0xad   :  { %v276_v61 = vsel %vm50_vm2, %v275_v60, 0.0  ;;  %v277_v62 = vsel %vm51_vm3, %v272_v59, 0.0 }
  0xae   :  { %v280_v63 = vrot.slane %v276_v61, 7  ;;  %v281_v0 = vrot.slane %v277_v62, 7 }
  0xaf   :  { %v293_v1 = vpop.permute.xlu0 %292  ;;  %v295_v2 = vpop.permute.xlu1 %294  ;;  %v455_v9 = vld [vmem:[#allocation2 + $0x40] sm:$0x7] }
  0xb0   :  { %284 = vst [vmem:[#allocation2 + $0x10] sm:$0x6] %v280_v63  ;;  %285 = vst [vmem:[#allocation2 + $0x18] sm:$0x6] %v281_v0  ;;  %v296_v3 = vsel %vm104_vm4, %v293_v1, %v295_v2  ;;  %v300_v4 = vsel %vm104_vm4, %v295_v2, %v293_v1  ;;  %v456_v5 = vld [vmem:[#allocation2 + $0x48] sm:$0x7] }
  0xb1   :  { %v301_v7 = vsel %vm60_vm5, %v296_v3, 0.0  ;;  %v302_v8 = vsel %vm61_vm6, %v300_v4, 0.0  ;;  %1189 = vmatprep.subr.msk.mxu0 %vm478_vm13, %v456_v5 }
  0xb2   :  { %v305_v10 = vrot.slane %v301_v7, 3  ;;  %v306_v11 = vrot.slane %v302_v8, 3  ;;  %1190 = vmatpush1.msk.msra.mxu0 %vm478_vm13, %v455_v9 }
  0xb3   :  { %v320_v12 = vpop.permute.xlu0 %319  ;;  %1191 = vmatmul.mubr.msk.f32.vlgmr.msra.gmra.mrb[0].mxu0 %vm459_vm14, %v1433_v6  ;;  %v323_v13 = vpop.permute.xlu1 %322 }
  0xb4   :  { %309 = vst [vmem:[#allocation2 + $0x10] sm:$0x60] %v305_v10  ;;  %310 = vst [vmem:[#allocation2 + $0x18] sm:$0x60] %v306_v11  ;;  %561 = vmatprep.mubr.f32.mxu0 %v1285_v25 }
  0xb7   :  { %v325_v16 = vpop.permute.xlu0 %324  ;;  %1192 = vmatmul.mubr.msk.f32.gmra.mrb[2].mxu0 %vm459_vm14, %v1447_v14  ;;  %v359_v17 = vpop.permute.xlu1 %358 }
  0xb8   :  { %v326_v18 = vsel %vm135_vm8, %v323_v13, %v325_v16  ;;  %v327_v19 = vsel %vm135_vm8, %v325_v16, %v320_v12  ;;  %v364_v20 = vsel %vm175_vm7, %v359_v17, %v361_v52  ;;  %v369_v21 = vsel %vm104_vm4, %v365_v15, %v359_v17  ;;  %567 = vmatprep.mubr.f32.mxu0 %v1285_v25 }
  0xb9   :  { %v330_v23 = vsel %vm79_vm1, %v320_v12, %v326_v18  ;;  %v332_v24 = vsel %vm51_vm3, %v327_v19, 0.0  ;;  %v370_v26 = vsel %vm60_vm5, %v364_v20, 0.0  ;;  %v371_v27 = vsel %vm61_vm6, %v369_v21, 0.0 }
  0xba   :  { %v331_v28 = vsel %vm50_vm2, %v330_v23, 0.0  ;;  %v336_v29 = vrot.slane %v332_v24, 1  ;;  %v374_v30 = vrot.slane %v370_v26, 5  ;;  %v375_v31 = vrot.slane %v371_v27, 5 }
  0xbb   :  { %v335_v32 = vrot.slane %v331_v28, 1  ;;  %v381_v33 = vpop.permute.xlu0 %380  ;;  %1193 = vmatmul.mubr.msk.f32.gmra.mrb[4].mxu0 %vm459_vm14, %v1460_v22  ;;  %v384_v34 = vpop.permute.xlu1 %383 }
  0xbc   :  { %340 = vst [vmem:[#allocation2 + $0x38] ss:$-28 sps:$4 sm:$0x81] %v336_v29   ;;  %378 = vst [vmem:[#allocation2 + $0x30] sm:$0x18] %v374_v30  ;;  %573 = vmatprep.mubr.f32.mxu0 %v1285_v25 }
  0xbd   :  { %379 = vst [vmem:[#allocation2 + $0x38] sm:$0x18] %v375_v31  ;;  %339 = vst [vmem:[#allocation2 + $0x30] ss:$-28 sps:$4 sm:$0x81] %v335_v32  }
  0xbf   :  { %v386_v36 = vpop.permute.xlu0 %385  ;;  %1194 = vmatmul.mubr.msk.f32.gmra.mrb[6].mxu0 %vm459_vm14, %v1477_v35  ;;  %v349_v37 = vpop.permute.xlu1 %348 }
  0xc0   :  { %v387_v40 = vsel %vm199_vm9, %v384_v34, %v386_v36  ;;  %v388_v41 = vsel %vm199_vm9, %v386_v36, %v381_v33  ;;  %579 = vmatprep.mubr.f32.mxu0 %v1285_v25 }
  0xc1   :  { %v391_v45 = vsel %vm79_vm1, %v381_v33, %v387_v40  ;;  %v393_v46 = vsel %vm51_vm3, %v388_v41, 0.0 }
  0xc2   :  { %v392_v47 = vsel %vm50_vm2, %v391_v45, 0.0  ;;  %v397_v48 = vrot.slane %v393_v46, 3 }
  0xc3   :  { %v396_v49 = vrot.slane %v392_v47, 3  ;;  %v351_v50 = vpop.permute.xlu0 %350  ;;  %1195 = vmatmul.mubr.msk.f32.gmra.mrb[8].mxu0 %vm459_vm14, %v445_v44  ;;  %v408_v51 = vpop.permute.xlu1 %407  ;;  %v450_v59 = vld [vmem:[#allocation2 + $0x18] sm:$0xff] }
  0xc4   :  { %401 = vst [vmem:[#allocation2 + $0x38] sm:$0x60] %v397_v48  ;;  %v353_v52 = vsel %vm162_vm10, %v349_v37, %v351_v50  ;;  %585 = vmatprep.mubr.f32.mxu0 %v1285_v25  ;;  %v449_v8 = vld [vmem:[#allocation2 + $0x10] sm:$0xff] }
  0xc5   :  { %400 = vst [vmem:[#allocation2 + $0x30] sm:$0x60] %v396_v49  ;;  %357 = vst [vmem:[#allocation2 + $0x38] sm:$0x6] %v353_v52 }
  0xc7   :  { %v410_v39 = vpop.permute.xlu0 %409  ;;  %1196 = vmatmul.mubr.msk.f32.gmra.mrb[10].mxu0 %vm459_vm14, %v446_v53  ;;  %v347_v38 = vpop.permute.xlu1 %346 }
  0xc8   :  { %v412_v54 = vsel %vm224_vm11, %v408_v51, %v410_v39  ;;  %v352_v55 = vsel %vm162_vm10, %v347_v38, %v349_v37 }
  0xc9   :  { %416 = vst [vmem:[#allocation2 + $0x58] ss:$-28 sps:$4 sm:$0x81] %v412_v54   ;;  %356 = vst [vmem:[#allocation2 + $0x30] sm:$0x6] %v352_v55 }
  0xcb   :  { %v406_v56 = vpop.permute.xlu0 %405  ;;  %v422_v57 = vpop.permute.xlu1 %421 }
  0xcc   :  { %v411_v58 = vsel %vm224_vm11, %v406_v56, %v408_v51 }
  0xcd   :  { %415 = vst [vmem:[#allocation2 + $0x50] ss:$-28 sps:$4 sm:$0x81] %v411_v58  }
  0xcf   :  { %v424_v60 = vpop.permute.xlu0 %423  ;;  %v420_v61 = vpop.permute.xlu1 %419 }
  0xd0   :  { %v426_v62 = vsel %vm239_vm12, %v422_v57, %v424_v60  ;;  %v425_v63 = vsel %vm239_vm12, %v420_v61, %v422_v57  ;;  %v454_v0 = vld [vmem:[#allocation2 + $0x38] sm:$0xff] }
  0xd1   :  { %v430_v1 = vsel %vm104_vm4, %v426_v62, %v420_v61  ;;  %v431_v2 = vsel %vm60_vm5, %v425_v63, 0.0  ;;  %v1209_v3 = vpack.c.bf16 %v454_v0, %v450_v59 }
  0xd2   :  { %v432_v4 = vsel %vm61_vm6, %v430_v1, 0.0  ;;  %v435_v5 = vrot.slane %v431_v2, 7 }
  0xd3   :  { %v436_v7 = vrot.slane %v432_v4, 7  ;;  %1210 = vmatprep.subr.bf16.mxu1 %v1209_v3 }
  0xd4   :  { %439 = vst [vmem:[#allocation2 + $0x50] sm:$0x6] %v435_v5  ;;  %v453_v9 = vld [vmem:[#allocation2 + $0x30] sm:$0xff] }
  0xd5   :  { %440 = vst [vmem:[#allocation2 + $0x58] sm:$0x6] %v436_v7  ;;  %v1211_v10 = vpack.c.bf16 %v453_v9, %v449_v8 }
  0xd7   :  { %1212 = vmatpush1.bf16.msra.mxu1 %v1211_v10 }
  0xdb   :  { %v457_v11 = vld [vmem:[#allocation2 + $0x50] sm:$0x7] }
  0xdc   :  { %v458_v12 = vld [vmem:[#allocation2 + $0x58] sm:$0x7] }
  0xdd   :  { %1197 = vmatprep.subr.msk.mxu1 %vm478_vm13, %v458_v12 }
  0xde   :  { %1198 = vmatpush1.msk.msra.mxu1 %vm478_vm13, %v457_v11 }
  0xdf   :  { %1199 = vmatmul.mubr.msk.f32.vlgmr.msra.gmra.mrb[0].mxu1 %vm459_vm14, %v1433_v6 }
  0xe0   :  { %662 = vmatprep.mubr.f32.mxu1 %v1285_v25 }
  0xe3   :  { %1200 = vmatmul.mubr.msk.f32.gmra.mrb[2].mxu1 %vm459_vm14, %v1447_v14 }
  0xe4   :  { %668 = vmatprep.mubr.f32.mxu1 %v1285_v25 }
  0xe7   :  { %1201 = vmatmul.mubr.msk.f32.gmra.mrb[4].mxu1 %vm459_vm14, %v1460_v22 }
  0xe8   :  { %674 = vmatprep.mubr.f32.mxu1 %v1285_v25 }
  0xeb   :  { %1202 = vmatmul.mubr.msk.f32.gmra.mrb[6].mxu1 %vm459_vm14, %v1477_v35 }
  0xec   :  { %680 = vmatprep.mubr.f32.mxu1 %v1285_v25 }
  0xef   :  { %1203 = vmatmul.mubr.msk.f32.gmra.mrb[8].mxu1 %vm459_vm14, %v445_v44 }
  0xf0   :  { %686 = vmatprep.mubr.f32.mxu1 %v1285_v25 }
  0xf3   :  { %1204 = vmatmul.mubr.msk.f32.gmra.mrb[10].mxu1 %vm459_vm14, %v446_v53 }
 0x186   :  { %v1526_v42 = vpop.f32.mrb[0].mxu0 }
 0x187   :  { %v1528_v43 = vpop.f32.mrb[1].mxu0  ;;  %v699_v6 = vmul.f32 %v1526_v42, %v1526_v42 }
 0x188   :  { %v711_v13 = vadd.f32 %v1528_v43, %v1526_v42  ;;  %v700_v14 = vmul.f32 %v1528_v43, %v1528_v43 }
 0x18a   :  { %712 = vadd.xlane.f32.xlu0 %v711_v13  ;;  %v1536_v15 = vpop.f32.mrb[2].mxu0  ;;  %v729_v16 = vadd.f32 %v700_v14, %v699_v6 }
 0x18b   :  { %v1538_v25 = vpop.f32.mrb[3].mxu0  ;;  %v701_v17 = vmul.f32 %v1536_v15, %v1536_v15 }
 0x18c   :  { %v714_v18 = vadd.f32 %v1538_v25, %v1536_v15  ;;  %v702_v19 = vmul.f32 %v1538_v25, %v1538_v25 }
 0x18e   :  { %730 = vadd.xlane.f32.xlu0 %v729_v16  ;;  %715 = vadd.xlane.f32.xlu1 %v714_v18  ;;  %v1546_v20 = vpop.f32.mrb[4].mxu0  ;;  %v732_v21 = vadd.f32 %v702_v19, %v701_v17 }
 0x18f   :  { %v1548_v22 = vpop.f32.mrb[5].mxu0  ;;  %v703_v23 = vmul.f32 %v1546_v20, %v1546_v20 }
 0x190   :  { %v717_v24 = vadd.f32 %v1548_v22, %v1546_v20  ;;  %v704_v26 = vmul.f32 %v1548_v22, %v1548_v22 }
 0x192   :  { %733 = vadd.xlane.f32.xlu1 %v732_v21  ;;  %718 = vadd.xlane.f32.xlu0 %v717_v24  ;;  %v1556_v27 = vpop.f32.mrb[6].mxu0  ;;  %v735_v28 = vadd.f32 %v704_v26, %v703_v23 }
 0x193   :  { %v1558_v29 = vpop.f32.mrb[7].mxu0  ;;  %v705_v30 = vmul.f32 %v1556_v27, %v1556_v27 }
 0x194   :  { %v720_v31 = vadd.f32 %v1558_v29, %v1556_v27  ;;  %v706_v32 = vmul.f32 %v1558_v29, %v1558_v29 }
 0x196   :  { %736 = vadd.xlane.f32.xlu1 %v735_v28  ;;  %721 = vadd.xlane.f32.xlu0 %v720_v31  ;;  %v1566_v33 = vpop.f32.mrb[8].mxu0  ;;  %v738_v34 = vadd.f32 %v706_v32, %v705_v30 }
 0x197   :  { %v1568_v35 = vpop.f32.mrb[9].mxu0  ;;  %v707_v36 = vmul.f32 %v1566_v33, %v1566_v33 }
 0x198   :  { %v723_v37 = vadd.f32 %v1568_v35, %v1566_v33  ;;  %v708_v40 = vmul.f32 %v1568_v35, %v1568_v35 }
 0x19a   :  { %739 = vadd.xlane.f32.xlu1 %v738_v34  ;;  %724 = vadd.xlane.f32.xlu0 %v723_v37  ;;  %v1576_v41 = vpop.f32.mrb[10].mxu0  ;;  %v741_v44 = vadd.f32 %v708_v40, %v707_v36 }
 0x19b   :  { %v1578_v45 = vpop.f32.mrb[11].mxu0  ;;  %v709_v46 = vmul.f32 %v1576_v41, %v1576_v41 }
 0x19c   :  { %v710_v47 = vmul.f32 %v1578_v45, %v1578_v45  ;;  %v726_v48 = vadd.f32 %v1578_v45, %v1576_v41 }
 0x19e   :  { %742 = vadd.xlane.f32.xlu1 %v741_v44  ;;  %727 = vadd.xlane.f32.xlu0 %v726_v48  ;;  %v744_v49 = vadd.f32 %v710_v47, %v709_v46 }
 0x1a2   :  { %745 = vadd.xlane.f32.xlu0 %v744_v49 }
 0x1b2   :  { %v1586_v50 = vpop.f32.mrb[0].mxu1 }
 0x1b3   :  { %v1588_v51 = vpop.f32.mrb[1].mxu1  ;;  %v935_v52 = vmul.f32 %v1586_v50, %v1586_v50 }
 0x1b4   :  { %v947_v53 = vadd.f32 %v1588_v51, %v1586_v50  ;;  %v936_v39 = vmul.f32 %v1588_v51, %v1588_v51 }
 0x1b6   :  { %v1596_v38 = vpop.f32.mrb[2].mxu1  ;;  %948 = vadd.xlane.f32.xlu1 %v947_v53  ;;  %v965_v54 = vadd.f32 %v936_v39, %v935_v52 }
 0x1b7   :  { %v1598_v55 = vpop.f32.mrb[3].mxu1  ;;  %v937_v56 = vmul.f32 %v1596_v38, %v1596_v38 }
 0x1b8   :  { %v950_v57 = vadd.f32 %v1598_v55, %v1596_v38  ;;  %v938_v58 = vmul.f32 %v1598_v55, %v1598_v55 }
 0x1ba   :  { %v1606_v59 = vpop.f32.mrb[4].mxu1  ;;  %951 = vadd.xlane.f32.xlu0 %v950_v57  ;;  %v968_v60 = vadd.f32 %v938_v58, %v937_v56 }
 0x1bb   :  { %v1608_v61 = vpop.f32.mrb[5].mxu1  ;;  %v939_v62 = vmul.f32 %v1606_v59, %v1606_v59 }
 0x1bc   :  { %v953_v63 = vadd.f32 %v1608_v61, %v1606_v59  ;;  %v940_v0 = vmul.f32 %v1608_v61, %v1608_v61 }
 0x1be   :  { %954 = vadd.xlane.f32.xlu1 %v953_v63  ;;  %v1616_v1 = vpop.f32.mrb[6].mxu1  ;;  %966 = vadd.xlane.f32.xlu0 %v965_v54  ;;  %v971_v2 = vadd.f32 %v940_v0, %v939_v62 }
 0x1bf   :  { %v1618_v3 = vpop.f32.mrb[7].mxu1  ;;  %v941_v4 = vmul.f32 %v1616_v1, %v1616_v1 }
 0x1c0   :  { %v956_v5 = vadd.f32 %v1618_v3, %v1616_v1  ;;  %v942_v7 = vmul.f32 %v1618_v3, %v1618_v3 }
 0x1c2   :  { %969 = vadd.xlane.f32.xlu1 %v968_v60  ;;  %v1626_v8 = vpop.f32.mrb[8].mxu1  ;;  %957 = vadd.xlane.f32.xlu0 %v956_v5  ;;  %v974_v9 = vadd.f32 %v942_v7, %v941_v4 }
 0x1c3   :  { %v1628_v10 = vpop.f32.mrb[9].mxu1  ;;  %v943_v11 = vmul.f32 %v1626_v8, %v1626_v8 }
 0x1c4   :  { %v959_v12 = vadd.f32 %v1628_v10, %v1626_v8  ;;  %v944_v6 = vmul.f32 %v1628_v10, %v1628_v10 }
 0x1c6   :  { %972 = vadd.xlane.f32.xlu1 %v971_v2  ;;  %v1636_v13 = vpop.f32.mrb[10].mxu1  ;;  %960 = vadd.xlane.f32.xlu0 %v959_v12  ;;  %v977_v14 = vadd.f32 %v944_v6, %v943_v11 }
 0x1c7   :  { %v1638_v16 = vpop.f32.mrb[11].mxu1  ;;  %v945_v17 = vmul.f32 %v1636_v13, %v1636_v13 }
 0x1c8   :  { %v946_v18 = vmul.f32 %v1638_v16, %v1638_v16  ;;  %v962_v19 = vadd.f32 %v1638_v16, %v1636_v13 }
 0x1ca   :  { %975 = vadd.xlane.f32.xlu1 %v974_v9  ;;  %963 = vadd.xlane.f32.xlu0 %v962_v19  ;;  %v980_v21 = vadd.f32 %v946_v18, %v945_v17 }
 0x1ce   :  { %978 = vadd.xlane.f32.xlu1 %v977_v14  ;;  %981 = vadd.xlane.f32.xlu0 %v980_v21 }
 0x217   :  { %v713_v23 = vpop.xlane.xlu0 %712 }
 0x218   :  { %v747_v36 = vsel %vm79_vm1, %v713_v23, 0.0 }
 0x21b   :  { %v731_v24 = vpop.xlane.xlu0 %730  ;;  %v716_v26 = vpop.xlane.xlu1 %715 }
 0x21c   :  { %v748_v31 = vsel %vm79_vm1, %v716_v26, 0.0  ;;  %v767_v52 = vsel %vm79_vm1, %v731_v24, 0.0 }
 0x21d   :  { %v749_v40 = vadd.f32 %v748_v31, %v747_v36 }
 0x21f   :  { %v734_v28 = vpop.xlane.xlu1 %733  ;;  %v719_v30 = vpop.xlane.xlu0 %718 }
 0x220   :  { %v750_v37 = vsel %vm79_vm1, %v719_v30, 0.0  ;;  %v768_v44 = vsel %vm79_vm1, %v734_v28, 0.0 }
 0x221   :  { %v751_v47 = vadd.f32 %v750_v37, %v749_v40  ;;  %v769_v54 = vadd.f32 %v768_v44, %v767_v52 }
 0x223   :  { %v737_v32 = vpop.xlane.xlu1 %736  ;;  %v722_v34 = vpop.xlane.xlu0 %721 }
 0x224   :  { %v752_v46 = vsel %vm79_vm1, %v722_v34, 0.0  ;;  %v770_v53 = vsel %vm79_vm1, %v737_v32, 0.0 }
 0x225   :  { %v753_v56 = vadd.f32 %v752_v46, %v751_v47  ;;  %v771_v58 = vadd.f32 %v770_v53, %v769_v54 }
 0x227   :  { %v740_v48 = vpop.xlane.xlu1 %739  ;;  %v725_v49 = vpop.xlane.xlu0 %724 }
 0x228   :  { %v754_v39 = vsel %vm79_vm1, %v725_v49, 0.0  ;;  %v772_v57 = vsel %vm79_vm1, %v740_v48, 0.0 }
 0x229   :  { %v755_v60 = vadd.f32 %v754_v39, %v753_v56  ;;  %v773_v4 = vadd.f32 %v772_v57, %v771_v58 }
 0x22b   :  { %v743_v62 = vpop.xlane.xlu1 %742  ;;  %v728_v63 = vpop.xlane.xlu0 %727 }
 0x22c   :  { %v774_v0 = vsel %vm79_vm1, %v743_v62, 0.0  ;;  %v756_v2 = vsel %vm79_vm1, %v728_v63, 0.0 }
 0x22d   :  { %v757_v5 = vadd.f32 %v756_v2, %v755_v60  ;;  %v775_v7 = vadd.f32 %v774_v0, %v773_v4 }
 0x22f   :  { %758 = vadd.xlane.f32.xlu1 %v757_v5  ;;  %v746_v9 = vpop.xlane.xlu0 %745 }
 0x230   :  { %v776_v11 = vsel %vm79_vm1, %v746_v9, 0.0 }
 0x231   :  { %v777_v12 = vadd.f32 %v776_v11, %v775_v7 }
 0x233   :  { %778 = vadd.xlane.f32.xlu0 %v777_v12 }
 0x243   :  { %v949_v6 = vpop.xlane.xlu1 %948 }
 0x244   :  { %v983_v14 = vsel %vm79_vm1, %v949_v6, 0.0 }
 0x247   :  { %v952_v17 = vpop.xlane.xlu0 %951 }
 0x248   :  { %v984_v18 = vsel %vm79_vm1, %v952_v17, 0.0 }
 0x249   :  { %v985_v19 = vadd.f32 %v984_v18, %v983_v14 }
 0x24b   :  { %v955_v21 = vpop.xlane.xlu1 %954  ;;  %v967_v23 = vpop.xlane.xlu0 %966 }
 0x24c   :  { %v986_v24 = vsel %vm79_vm1, %v955_v21, 0.0  ;;  %v1003_v28 = vsel %vm79_vm1, %v967_v23, 0.0  ;;  %v1286_v23 = vmov 0  }
 0x24d   :  { %v987_v26 = vadd.f32 %v986_v24, %v985_v19  ;;  %1241 = vset.pattern.permute.xlu0 %v1286_v23  ;;  %1242 = vset.pattern.permute.xlu1 %v1286_v23 }
 0x24f   :  { %v970_v30 = vpop.xlane.xlu1 %969  ;;  %v958_v31 = vpop.xlane.xlu0 %957 }
 0x250   :  { %v1004_v32 = vsel %vm79_vm1, %v970_v30, 0.0  ;;  %v988_v34 = vsel %vm79_vm1, %v958_v31, 0.0 }
 0x251   :  { %v1005_v36 = vadd.f32 %v1004_v32, %v1003_v28  ;;  %v989_v37 = vadd.f32 %v988_v34, %v987_v26 }
 0x253   :  { %v973_v40 = vpop.xlane.xlu1 %972  ;;  %v961_v44 = vpop.xlane.xlu0 %960 }
 0x254   :  { %v1006_v46 = vsel %vm79_vm1, %v973_v40, 0.0  ;;  %v990_v47 = vsel %vm79_vm1, %v961_v44, 0.0 }
 0x255   :  { %v1007_v48 = vadd.f32 %v1006_v46, %v1005_v36  ;;  %v991_v49 = vadd.f32 %v990_v47, %v989_v37 }
 0x257   :  { %v976_v52 = vpop.xlane.xlu1 %975  ;;  %v964_v53 = vpop.xlane.xlu0 %963 }
 0x258   :  { %v1008_v39 = vsel %vm79_vm1, %v976_v52, 0.0  ;;  %v992_v54 = vsel %vm79_vm1, %v964_v53, 0.0 }
 0x259   :  { %v1009_v56 = vadd.f32 %v1008_v39, %v1007_v48  ;;  %v993_v57 = vadd.f32 %v992_v54, %v991_v49  ;;  %v1677_v54 = vld [vmem:[%s1796_s2] sm:$0xff] }
 0x25b   :  { %v979_v58 = vpop.xlane.xlu1 %978  ;;  %v982_v60 = vpop.xlane.xlu0 %981  ;;  %994 = vadd.xlane.f32.xlu1 %v993_v57 }
 0x25c   :  { %v1010_v62 = vsel %vm79_vm1, %v979_v58, 0.0  ;;  %v1012_v63 = vsel %vm79_vm1, %v982_v60, 0.0  ;;  %v1687_v58 = vld [vmem:[%s1796_s2 + $0x10] sm:$0xff] }
 0x25d   :  { %v1011_v0 = vadd.f32 %v1010_v62, %v1009_v56  ;;  %v1682_v56 = vld [vmem:[%s1796_s2 + $0x8] sm:$0xff] }
 0x25f   :  { %v1013_v2 = vadd.f32 %v1012_v63, %v1011_v0  ;;  %v1697_v0 = vld [vmem:[%s1796_s2 + $0x20] sm:$0xff] }
 0x261   :  { %1014 = vadd.xlane.f32.xlu0 %v1013_v2 }
 0x2bc   :  { %v759_v4 = vpop.xlane.xlu1 %758 }
 0x2bd   :  { %v760_v5 = vrot.slane %v759_v4, 4 }
 0x2bf   :  { %v761_v7 = vadd.f32 %v760_v5, %v759_v4  ;;  %v1705_v5 = vld [vmem:[%s1796_s2 + $0x18] sm:$0xff] }
 0x2c0   :  { %v779_v9 = vpop.xlane.xlu0 %778 }
 0x2c1   :  { %v762_v11 = vrot.slane %v761_v7, 2  ;;  %v780_v12 = vrot.slane %v779_v9, 4 }
 0x2c3   :  { %v781_v6 = vadd.f32 %v780_v12, %v779_v9  ;;  %v763_v14 = vadd.f32 %v762_v11, %v761_v7 }
 0x2c5   :  { %v782_v17 = vrot.slane %v781_v6, 2  ;;  %v764_v18 = vrot.slane %v763_v14, 1 }
 0x2c7   :  { %v765_v19 = vadd.f32 %v764_v18, %v763_v14  ;;  %v783_v21 = vadd.f32 %v782_v17, %v781_v6  ;;  %v1714_v6 = vld [vmem:[%s1796_s2 + $0x28] sm:$0xff] }
 0x2c9   :  { %1213 = vpush %v765_v19  ;;  %v784_v24 = vrot.slane %v783_v21, 1 }
 0x2cb   :  { %v785_v26 = vadd.f32 %v784_v24, %v783_v21 }
 0x2cd   :  { %1215 = vpush %v785_v26 }
 0x2e8   :  { %v995_v28 = vpop.xlane.xlu1 %994 }
 0x2e9   :  { %v996_v31 = vrot.slane %v995_v28, 4 }
 0x2eb   :  { %v997_v34 = vadd.f32 %v996_v31, %v995_v28 }
 0x2ed   :  { %v998_v37 = vrot.slane %v997_v34, 2 }
 0x2ee   :  { %v1015_v30 = vpop.xlane.xlu0 %1014 }
 0x2ef   :  { %v1016_v32 = vrot.slane %v1015_v30, 4  ;;  %v999_v46 = vadd.f32 %v998_v37, %v997_v34 }
 0x2f1   :  { %v1017_v36 = vadd.f32 %v1016_v32, %v1015_v30  ;;  %v1000_v48 = vrot.slane %v999_v46, 1 }
 0x2f3   :  { %v1018_v40 = vrot.slane %v1017_v36, 2  ;;  %v1001_v53 = vadd.f32 %v1000_v48, %v999_v46 }
 0x2f5   :  { %v1019_v47 = vadd.f32 %v1018_v40, %v1017_v36 }
 0x2f7   :  { %v1020_v49 = vrot.slane %v1019_v47, 1 }
 0x2f9   :  { %v1021_v39 = vadd.f32 %v1020_v49, %v1019_v47  ;;  %v1287_v49 = vmov 1  }
 0x2fa   :  { %s1214_s1 = spop %1213 }
 0x2fb   :  { %s1670_s8 = smul.f32 8.138021e-05, %s1214_s1 }
 0x2fd   :  { %s789_s9 = smul.f32 %s1670_s8, %s1670_s8  ;;  %v802_v63 = vstv %s1670_s8 }
 0x2fe   :  { %s1216_s10 = spop %1215 }
 0x2ff   :  { %s788_s11 = smul.f32 8.138021e-05, %s1216_s10 }
 0x301   :  { %s790_s12 = ssub.f32 %s788_s11, %s789_s9 }
 0x303   :  { %s791_s13 = sadd.f32 1e-05, %s790_s12 }
 0x305   :  { %v792_v44 = vstv %s791_s13 }
 0x306   :  { %1247 = vrsqrt.f32 %v792_v44 }
 0x310   :  { %v1248_v52 = vpop.eup %1247 }
 0x311   :  { %1217 = vpush %v1248_v52 }
 0x312   :  { %1219 = vpush %v1001_v53 }
 0x313   :  { %1221 = vpush %v1021_v39 }
 0x342   :  { %s1218_s19 = spop %1217 }
 0x343   :  { %v795_v57 = vstv %s1218_s19  ;;  %s1220_s20 = spop %1219 }
 0x344   :  { %s1689_s23 = smul.f32 8.138021e-05, %s1220_s20  ;;  %s1222_s0 = spop %1221  ;;  %v796_v60 = vmul.f32 %v795_v57, %v1677_v54  ;;  %v797_v62 = vmul.f32 %v795_v57, %v1682_v56  ;;  %v798_v4 = vmul.f32 %v795_v57, %v1687_v58  ;;  %v800_v9 = vmul.f32 %v795_v57, %v1697_v0 }
 0x345   :  { %s1024_s24 = smul.f32 8.138021e-05, %s1222_s0  ;;  %v799_v12 = vmul.f32 %v795_v57, %v1705_v5  ;;  %v801_v19 = vmul.f32 %v795_v57, %v1714_v6 }
 0x346   :  { %s1025_s27 = smul.f32 %s1689_s23, %s1689_s23  ;;  %841 = vperm.xlu0 %1241, %v796_v60   ;;  %v803_v2 = vmul.f32 %v802_v63, %v796_v60  ;;  %v804_v7 = vmul.f32 %v802_v63, %v797_v62  ;;  %v805_v11 = vmul.f32 %v802_v63, %v798_v4  ;;  %v807_v17 = vmul.f32 %v802_v63, %v800_v9 }
 0x347   :  { %v806_v18 = vmul.f32 %v802_v63, %v799_v12  ;;  %v808_v21 = vmul.f32 %v802_v63, %v801_v19  ;;  %v1038_v30 = vstv %s1689_s23 }
 0x348   :  { %s1026_s30 = ssub.f32 %s1024_s24, %s1025_s27  ;;  %815 = vrot.lane.b32.xlu1 %v803_v2, %s1277_s15 }
 0x34a   :  { %s1027_s4 = sadd.f32 1e-05, %s1026_s30  ;;  %817 = vrot.lane.b32.xlu0 %v804_v7, %s1277_s15 }
 0x34c   :  { %v1028_v14 = vstv %s1027_s4  ;;  %819 = vrot.lane.b32.xlu1 %v805_v11, %s1277_s15 }
 0x34d   :  { %1249 = vrsqrt.f32 %v1028_v14 }
 0x34e   :  { %823 = vrot.lane.b32.xlu0 %v807_v17, %s1277_s15 }
 0x350   :  { %821 = vrot.lane.b32.xlu1 %v806_v18, %s1277_s15 }
 0x354   :  { %825 = vrot.lane.b32.xlu1 %v808_v21, %s1277_s15 }
 0x357   :  { %v1250_v23 = vpop.eup %1249 }
 0x358   :  { %1223 = vpush %v1250_v23 }
 0x389   :  { %s1224_s2 = spop %1223 }
 0x38a   :  { %v1031_v24 = vstv %s1224_s2 }
 0x38b   :  { %v1034_v26 = vmul.f32 %v1031_v24, %v1687_v58  ;;  %v1032_v28 = vmul.f32 %v1031_v24, %v1677_v54  ;;  %v1036_v34 = vmul.f32 %v1031_v24, %v1697_v0  ;;  %v1033_v36 = vmul.f32 %v1031_v24, %v1682_v56 }
 0x38c   :  { %v1035_v44 = vmul.f32 %v1031_v24, %v1705_v5  ;;  %v1037_v47 = vmul.f32 %v1031_v24, %v1714_v6 }
 0x38d   :  { %v1041_v31 = vmul.f32 %v1038_v30, %v1034_v26  ;;  %v1039_v32 = vmul.f32 %v1038_v30, %v1032_v28  ;;  %v1043_v37 = vmul.f32 %v1038_v30, %v1036_v34  ;;  %v1040_v40 = vmul.f32 %v1038_v30, %v1033_v36 }
 0x38e   :  { %v1042_v46 = vmul.f32 %v1038_v30, %v1035_v44  ;;  %v1044_v48 = vmul.f32 %v1038_v30, %v1037_v47 }
 0x38f   :  { %1055 = vrot.lane.b32.xlu0 %v1041_v31, %s1277_s15  ;;  %1051 = vrot.lane.b32.xlu1 %v1039_v32, %s1277_s15 }
 0x393   :  { %1059 = vrot.lane.b32.xlu0 %v1043_v37, %s1277_s15  ;;  %1053 = vrot.lane.b32.xlu1 %v1040_v40, %s1277_s15 }
 0x397   :  { %846 = vperm.xlu0 %1241, %v797_v62   ;;  %1057 = vrot.lane.b32.xlu1 %v1042_v46, %s1277_s15 }
 0x39b   :  { %856 = vperm.xlu0 %1241, %v799_v12   ;;  %1061 = vrot.lane.b32.xlu1 %v1044_v48, %s1277_s15  ;;  %s1288_s15 = smov [#allocation3]  }
 0x39c   :  { %s1177_s7 = sshll.u32 %s1288_s15, 4  ;;  %s1178_s7 = int_to_ptr.vmem [resolvable:$true] %s1177_s7 }
 0x39d   :  { %s1251_s1 = scalar_lea.vmem %s1178_s7, 3072  ;;  %p1256_p1 = scmp.lt.s32.totalorder %s1178_s7, %s1178_s7 }
 0x39e   :  { %p1252_p0 = scmp.ne.s32.totalorder %s1178_s7, %s1251_s1  ;;  %p1257_p2 = scmp.lt.s32.totalorder %s1251_s1, %s1251_s1 }
 0x39f   :  { %866 = vperm.xlu0 %1241, %v801_v19   ;;  %851 = vperm.xlu1 %1242, %v798_v4  }
 0x3a0   :  { %p1258_p3 = por %p1257_p2, %p1256_p1 }
 0x3a2   :  { %p1259_p4 = pnand %p1258_p3, %p1252_p0 }
 0x3a3   :  { %1077 = vperm.xlu0 %1241, %v1032_v28   ;;  %861 = vperm.xlu1 %1242, %v800_v9  }
 0x3a7   :  { %1092 = vperm.xlu0 %1241, %v1035_v44   ;;  %1082 = vperm.xlu1 %1242, %v1033_v36  }
 0x3ab   :  { %1102 = vperm.xlu0 %1241, %v1037_v47   ;;  %1087 = vperm.xlu1 %1242, %v1034_v26  }
 0x3af   :  { %1097 = vperm.xlu1 %1242, %v1036_v34   ;;  %1244 = vset.pattern.permute.xlu0 %v1287_v49 }
 0x3b3   :  { %1243 = vset.pattern.permute.xlu1 %v1287_v49 }
 0x3ba   :  { %v816_v52 = vpop.permute.xlu1 %815 }
 0x3bb   :  { %v833_v53 = vsub.f32 %v1677_v54, %v816_v52 }
 0x3bd   :  { %883 = vperm.xlu1 %1243, %v833_v53  }
 0x3be   :  { %v820_v39 = vpop.permute.xlu1 %819 }
 0x3bf   :  { %v835_v57 = vsub.f32 %v1687_v58, %v820_v39 }
 0x3c1   :  { %893 = vperm.xlu1 %1243, %v835_v57  }
 0x3c2   :  { %v822_v60 = vpop.permute.xlu1 %821 }
 0x3c3   :  { %v836_v62 = vsub.f32 %v1705_v5, %v822_v60 }
 0x3c5   :  { %898 = vperm.xlu1 %1243, %v836_v62   ;;  %v842_v63 = vpop.permute.xlu0 %841 }
 0x3c6   :  { %v869_v2 = vmul.f32 %v842_v63, %v1526_v42  ;;  %v870_v4 = vmul.f32 %v842_v63, %v1528_v43  ;;  %v826_v7 = vpop.permute.xlu1 %825 }
 0x3c7   :  { %v838_v9 = vsub.f32 %v1714_v6, %v826_v7 }
 0x3c9   :  { %908 = vperm.xlu1 %1243, %v838_v9   ;;  %v818_v11 = vpop.permute.xlu0 %817 }
 0x3ca   :  { %v834_v12 = vsub.f32 %v1682_v56, %v818_v11 }
 0x3cc   :  { %888 = vperm.xlu0 %1244, %v834_v12  }
 0x3cd   :  { %v824_v14 = vpop.permute.xlu0 %823 }
 0x3ce   :  { %v837_v17 = vsub.f32 %v1697_v0, %v824_v14 }
 0x3d0   :  { %903 = vperm.xlu0 %1244, %v837_v17  }
 0x401   :  { %v1052_v18 = vpop.permute.xlu1 %1051  ;;  %v1056_v19 = vpop.permute.xlu0 %1055 }
 0x402   :  { %v1069_v21 = vsub.f32 %v1677_v54, %v1052_v18  ;;  %v1071_v43 = vsub.f32 %v1687_v58, %v1056_v19 }
 0x404   :  { %1119 = vperm.xlu1 %1243, %v1069_v21  }
 0x405   :  { %v1054_v42 = vpop.permute.xlu1 %1053  ;;  %v1060_v24 = vpop.permute.xlu0 %1059 }
 0x406   :  { %v1070_v23 = vsub.f32 %v1682_v56, %v1054_v42  ;;  %v1073_v28 = vsub.f32 %v1697_v0, %v1060_v24 }
 0x408   :  { %1124 = vperm.xlu0 %1244, %v1070_v23   ;;  %1129 = vperm.xlu1 %1243, %v1071_v43  }
 0x409   :  { %v1058_v26 = vpop.permute.xlu1 %1057 }
 0x40a   :  { %v1072_v30 = vsub.f32 %v1705_v5, %v1058_v26 }
 0x40c   :  { %1134 = vperm.xlu1 %1243, %v1072_v30   ;;  %1139 = vperm.xlu0 %1244, %v1073_v28  }
 0x40d   :  { %v1062_v31 = vpop.permute.xlu1 %1061 }
 0x40e   :  { %v1074_v32 = vsub.f32 %v1714_v6, %v1062_v31 }
 0x410   :  { %1144 = vperm.xlu1 %1243, %v1074_v32  }
 0x416   :  { %v847_v54 = vpop.permute.xlu0 %846 }
 0x417   :  { %v871_v12 = vmul.f32 %v847_v54, %v1536_v15 }
 0x41a   :  { %v857_v34 = vpop.permute.xlu0 %856 }
 0x41b   :  { %v876_v7 = vmul.f32 %v857_v34, %v1558_v29 }
 0x41e   :  { %v852_v36 = vpop.permute.xlu1 %851  ;;  %v867_v58 = vpop.permute.xlu0 %866 }
 0x41f   :  { %v873_v62 = vmul.f32 %v852_v36, %v1546_v20  ;;  %v880_v20 = vmul.f32 %v867_v58, %v1578_v45 }
 0x422   :  { %v862_v37 = vpop.permute.xlu1 %861  ;;  %v1078_v56 = vpop.permute.xlu0 %1077 }
 0x423   :  { %v1105_v40 = vmul.f32 %v1078_v56, %v1586_v50  ;;  %v1106_v44 = vmul.f32 %v1078_v56, %v1588_v51  ;;  %v877_v18 = vmul.f32 %v862_v37, %v1566_v33 }
 0x426   :  { %v1083_v46 = vpop.permute.xlu1 %1082  ;;  %v1093_v0 = vpop.permute.xlu0 %1092 }
 0x427   :  { %v1107_v5 = vmul.f32 %v1083_v46, %v1596_v38  ;;  %v1108_v47 = vmul.f32 %v1083_v46, %v1598_v55  ;;  %v1753_v48 = vmul.f32 %v1093_v0, %v1616_v1  ;;  %v1756_v6 = vmul.f32 %v1093_v0, %v1618_v3 }
 0x42a   :  { %v1088_v49 = vpop.permute.xlu1 %1087  ;;  %v1103_v52 = vpop.permute.xlu0 %1102 }
 0x42b   :  { %v1109_v53 = vmul.f32 %v1088_v49, %v1606_v59  ;;  %v1110_v50 = vmul.f32 %v1088_v49, %v1608_v61  ;;  %v1761_v51 = vmul.f32 %v1103_v52, %v1636_v13  ;;  %v1764_v39 = vmul.f32 %v1103_v52, %v1638_v16 }
 0x42c   :  { %v874_v59 = vmul.f32 %v852_v36, %v1548_v22  ;;  %v875_v16 = vmul.f32 %v857_v34, %v1556_v27  ;;  %v872_v27 = vmul.f32 %v847_v54, %v1538_v25 }
 0x42e   :  { %v1098_v38 = vpop.permute.xlu1 %1097 }
 0x42f   :  { %v1113_v55 = vmul.f32 %v1098_v38, %v1626_v8  ;;  %v1114_v1 = vmul.f32 %v1098_v38, %v1628_v10 }
 0x43c   :  { %v884_v57 = vpop.permute.xlu1 %883 }
 0x43d   :  { %v911_v3 = vadd.f32 %v884_v57, %v869_v2  ;;  %v912_v60 = vadd.f32 %v884_v57, %v870_v4  ;;  %v879_v2 = vmul.f32 %v867_v58, %v1576_v41  ;;  %v878_v41 = vmul.f32 %v862_v37, %v1568_v35 }
 0x43f   :  { %923 = vst [vmem:[#allocation3] sm:$0xff] %v911_v3  ;;  %924 = vst [vmem:[#allocation3 + $0x8] sm:$0xff] %v912_v60 }
 0x440   :  { %v894_v61 = vpop.permute.xlu1 %893 }
 0x441   :  { %v915_v13 = vadd.f32 %v894_v61, %v873_v62  ;;  %v916_v63 = vadd.f32 %v894_v61, %v874_v59 }
 0x443   :  { %927 = vst [vmem:[#allocation3 + $0x20] sm:$0xff] %v915_v13  ;;  %928 = vst [vmem:[#allocation3 + $0x28] sm:$0xff] %v916_v63 }
 0x444   :  { %v899_v8 = vpop.permute.xlu1 %898 }
 0x445   :  { %v917_v10 = vadd.f32 %v899_v8, %v875_v16  ;;  %v918_v9 = vadd.f32 %v899_v8, %v876_v7 }
 0x447   :  { %929 = vst [vmem:[#allocation3 + $0x30] sm:$0xff] %v917_v10  ;;  %930 = vst [vmem:[#allocation3 + $0x38] sm:$0xff] %v918_v9 }
 0x448   :  { %v909_v22 = vpop.permute.xlu1 %908 }
 0x449   :  { %v921_v4 = vadd.f32 %v909_v22, %v879_v2  ;;  %v922_v11 = vadd.f32 %v909_v22, %v880_v20 }
 0x44b   :  { %933 = vst [vmem:[#allocation3 + $0x50] sm:$0xff] %v921_v4  ;;  %934 = vst [vmem:[#allocation3 + $0x58] sm:$0xff] %v922_v11  ;;  %v889_v29 = vpop.permute.xlu0 %888 }
 0x44c   :  { %v913_v14 = vadd.f32 %v889_v29, %v871_v12  ;;  %v914_v17 = vadd.f32 %v889_v29, %v872_v27 }
 0x44e   :  { %925 = vst [vmem:[#allocation3 + $0x10] sm:$0xff] %v913_v14  ;;  %926 = vst [vmem:[#allocation3 + $0x18] sm:$0xff] %v914_v17 }
 0x44f   :  { %v904_v45 = vpop.permute.xlu0 %903 }
 0x450   :  { %v919_v19 = vadd.f32 %v904_v45, %v877_v18  ;;  %v920_v21 = vadd.f32 %v904_v45, %v878_v41 }
 0x452   :  { %931 = vst [vmem:[#allocation3 + $0x40] sm:$0xff] %v919_v19  ;;  %932 = vst [vmem:[#allocation3 + $0x48] sm:$0xff] %v920_v21 }
 0x483   :  { %v1120_v42 = vpop.permute.xlu1 %1119 }
 0x484   :  { %v1147_v15 = vadd.f32 %v1120_v42, %v1105_v40  ;;  %v1148_v43 = vadd.f32 %v1120_v42, %v1106_v44 }
 0x486   :  { %1160 = vst [vmem:[#allocation3 + $0x60] sm:$0xff] %v1147_v15  ;;  %1161 = vst [vmem:[#allocation3 + $0x68] sm:$0xff] %v1148_v43 }
 0x487   :  { %v1130_v25 = vpop.permute.xlu1 %1129  ;;  %v1125_v23 = vpop.permute.xlu0 %1124 }
 0x488   :  { %v1151_v24 = vadd.f32 %v1130_v25, %v1109_v53  ;;  %v1152_v26 = vadd.f32 %v1130_v25, %v1110_v50  ;;  %v1149_v28 = vadd.f32 %v1125_v23, %v1107_v5  ;;  %v1150_v33 = vadd.f32 %v1125_v23, %v1108_v47 }
 0x48a   :  { %1164 = vst [vmem:[#allocation3 + $0x80] sm:$0xff] %v1151_v24  ;;  %1165 = vst [vmem:[#allocation3 + $0x88] sm:$0xff] %v1152_v26 }
 0x48b   :  { %1162 = vst [vmem:[#allocation3 + $0x70] sm:$0xff] %v1149_v28  ;;  %1163 = vst [vmem:[#allocation3 + $0x78] sm:$0xff] %v1150_v33  ;;  %v1135_v35 = vpop.permute.xlu1 %1134  ;;  %v1140_v30 = vpop.permute.xlu0 %1139 }
 0x48c   :  { %v1153_v31 = vadd.f32 %v1135_v35, %v1753_v48  ;;  %v1154_v32 = vadd.f32 %v1135_v35, %v1756_v6  ;;  %v1155_v54 = vadd.f32 %v1140_v30, %v1113_v55  ;;  %v1156_v34 = vadd.f32 %v1140_v30, %v1114_v1 }
 0x48e   :  { %1166 = vst [vmem:[#allocation3 + $0x90] sm:$0xff] %v1153_v31  ;;  %1167 = vst [vmem:[#allocation3 + $0x98] sm:$0xff] %v1154_v32 }
 0x48f   :  { %1168 = vst [vmem:[#allocation3 + $0xa0] sm:$0xff] %v1155_v54  ;;  %1169 = vst [vmem:[#allocation3 + $0xa8] sm:$0xff] %v1156_v34  ;;  %v1145_v36 = vpop.permute.xlu1 %1144 }
 0x490   :  { %v1157_v58 = vadd.f32 %v1145_v36, %v1761_v51  ;;  %v1158_v37 = vadd.f32 %v1145_v36, %v1764_v39 }
 0x492   :  { %1170 = vst [vmem:[#allocation3 + $0xb0] sm:$0xff] %v1157_v58  ;;  %1171 = vst [vmem:[#allocation3 + $0xb8] sm:$0xff] %v1158_v37 }
 0x493   :  { %1262 = shalt.err (!%p1259_p4)
}
 0x494   :  { %s1263_s10 = scalar_lea.hbm %s1797_s3, 3072 }
 0x495   :  { %p1264_p5 = scmp.ne.s32.totalorder %s1797_s3, %s1263_s10  ;;  %p1267_p6 = scmp.lt.u32.totalorder %s1263_s10, %s1797_s3 }
 0x497   :  { %p1269_p7 = pnand %p1267_p6, %p1264_p5 }
 0x499   :  { %1272 = shalt.err (!%p1269_p7)
}
 0x49a   :  { %s1289_s16 = smov 256   ;;  %s1290_s17 = smov 16  }
 0x49b   :  { %1183 = dma.vmem_to_hbm [thread:$0]  %s1178_s7, 3072, %s1797_s3, [#allocation4], %s1289_s16, %s1289_s16, %s1290_s17  }
 0x49c   :  { %1273 = dma.done.wait [#allocation4], 3072  }
 0x49d   :  { %1274 = vsyncadd [#allocation4], 4294964224 }
 0x49e   :  { %1187 = vsyncpa [#allocation4], 1 }

</bundles_post_ra>
